<compile_context>
chip_gen: v5e
topology: v5e:2x2
jax: 0.10.0
libtpu: 0.0.40
codegen_flags: <defaults>
</compile_context>

<pallas_src>
import jax
import jax.numpy as jnp
from jax.experimental import pallas as pl
from jax.experimental.pallas import tpu as pltpu


# ---------------------------------------------------------------------------
# Fused kernel: grid = (num_splits, tiles_per_split); one node tile per step.
#   x_ref     : (TM, in_dim)   bf16  (streamed tile of node features)
#   batch_ref : (TM, 1)        i32   (graph id of each node; padded rows = G)
#   w1        : (in_dim, hid)  bf16   b1 : (1, hid)  f32
#   w2        : (hid, hid)     bf16   b2 : (1, hid)  f32
#   w3        : (hid, out)     bf16   b3 : (1, out)  f32
#   o_ref     : (1, G, out)    f32   (per-split resident running per-graph max)
# ---------------------------------------------------------------------------
def structdnn_kernel(x_ref, batch_ref, w1_ref, b1_ref, w2_ref, b2_ref,
                     w3_ref, b3_ref, o_ref):
    neg = jnp.finfo(jnp.float32).min

    @pl.when(pl.program_id(1) == 0)
    def _init():
        o_ref[...] = jnp.full(o_ref.shape, neg, o_ref.dtype)

    # fc1 -> ReLU
    h = jnp.dot(x_ref[...], w1_ref[...], preferred_element_type=jnp.float32)
    h = jnp.maximum(h + b1_ref[...], 0.0)
    # dropout == identity (eval); fc2 -> ReLU
    h = jnp.dot(h.astype(jnp.bfloat16), w2_ref[...],
                preferred_element_type=jnp.float32)
    h = jnp.maximum(h + b2_ref[...], 0.0)
    # dropout == identity (eval); fc3 -> ReLU
    h = jnp.dot(h.astype(jnp.bfloat16), w3_ref[...],
                preferred_element_type=jnp.float32)
    h = jnp.maximum(h + b3_ref[...], 0.0)                 # (TM, out) f32

    # global_max_pool over this tile: per-graph 2-D masked max (no 3-D blow-up).
    bids = batch_ref[...]                                 # (TM, 1) i32
    num_graphs = o_ref.shape[1]
    rows = []
    for g in range(num_graphs):                           # G is small & static
        m = bids == g                                     # (TM, 1) bool
        rows.append(jnp.max(jnp.where(m, h, neg), axis=0, keepdims=True))  # (1, out)
    tile_gmax = jnp.concatenate(rows, axis=0)             # (G, out)
    o_ref[...] = jnp.maximum(o_ref[...], tile_gmax[None, :, :])


def structdnn_forward(x_feat, batch, params, num_graphs, *,
                      node_tile=256, num_splits=2):
    """x_feat: (N, in_dim) f32, batch: (N,) int graph ids -> (num_graphs, out_dim)."""
    n, in_dim = x_feat.shape
    hid_dim = params["w2"].shape[0]
    out_dim = params["w3"].shape[1]
    assert in_dim % 128 == 0 and hid_dim % 128 == 0 and out_dim % 128 == 0, \
        (in_dim, hid_dim, out_dim)
    assert node_tile % 128 == 0, node_tile

    # Pad the node axis so it divides num_splits * node_tile; padded rows get an
    # out-of-range graph id (== num_graphs) so they never win any per-graph max.
    chunk = node_tile * num_splits
    n_pad = int(pl.cdiv(n, chunk)) * chunk
    pad = n_pad - n
    x_bf16 = x_feat.astype(jnp.bfloat16)
    batch = batch.astype(jnp.int32)
    if pad:
        x_bf16 = jnp.pad(x_bf16, ((0, pad), (0, 0)))
        batch = jnp.pad(batch, (0, pad), constant_values=num_graphs)
    batch2d = batch.reshape(n_pad, 1)

    tiles_per_split = n_pad // chunk

    node_map = lambda c, i: (c * tiles_per_split + i, 0)   # streamed node tiles
    const = lambda c, i: (0, 0)                            # resident weights/biases

    partial = pl.pallas_call(
        structdnn_kernel,
        out_shape=jax.ShapeDtypeStruct((num_splits, num_graphs, out_dim),
                                       jnp.float32),
        grid_spec=pltpu.PrefetchScalarGridSpec(
            num_scalar_prefetch=0,
            grid=(num_splits, tiles_per_split),
            in_specs=[
                pl.BlockSpec((node_tile, in_dim), node_map),   # x tile (bf16)
                pl.BlockSpec((node_tile, 1), node_map),        # graph ids
                pl.BlockSpec((in_dim, hid_dim), const),        # w1 (bf16, resident)
                pl.BlockSpec((1, hid_dim), const),             # b1
                pl.BlockSpec((hid_dim, hid_dim), const),       # w2
                pl.BlockSpec((1, hid_dim), const),             # b2
                pl.BlockSpec((hid_dim, out_dim), const),       # w3
                pl.BlockSpec((1, out_dim), const),             # b3
            ],
            out_specs=pl.BlockSpec((1, num_graphs, out_dim),
                                   lambda c, i: (c, 0, 0)),
        ),
        compiler_params=pltpu.CompilerParams(
            # split axis parallel (v7x 2-TC), node-tile axis is a running-max
            # accumulator -> arbitrary.
            dimension_semantics=("parallel", "arbitrary"),
            vmem_limit_bytes=32 * 1024 * 1024,
        ),
    )(x_bf16, batch2d, params["w1"], params["b1"],
      params["w2"], params["b2"], params["w3"], params["b3"])

    # Combine per-split partial maxima (trivial; runs as plain XLA).
    return jnp.max(partial, axis=0)


# ---------------------------------------------------------------------------
# Pure-JAX reference (same bf16-weight numerics as the kernel) + params
# ---------------------------------------------------------------------------
def structdnn_reference(x_feat, batch, params, num_graphs):
    f32 = jnp.float32
    h = jnp.maximum(jnp.dot(x_feat.astype(jnp.bfloat16), params["w1"],
                            preferred_element_type=f32) + params["b1"], 0.0)
    h = jnp.maximum(jnp.dot(h.astype(jnp.bfloat16), params["w2"],
                            preferred_element_type=f32) + params["b2"], 0.0)
    h = jnp.maximum(jnp.dot(h.astype(jnp.bfloat16), params["w3"],
                            preferred_element_type=f32) + params["b3"], 0.0)
    neg = jnp.finfo(f32).min
    onehot = batch[:, None] == jnp.arange(num_graphs)[None, :]
    return jnp.max(jnp.where(onehot[:, :, None], h[:, None, :], neg), axis=0)


def init_params(key, in_dim, hid_dim, out_dim):
    """Weights stored (in_features, out_features), bf16; biases (1, n), f32."""
    ks = jax.random.split(key, 6)
    s = 0.02

    def w(k, shape):
        return (s * jax.random.normal(k, shape, jnp.float32)).astype(jnp.bfloat16)

    def b(k, n):
        return s * jax.random.normal(k, (1, n), jnp.float32)

    return {
        "w1": w(ks[0], (in_dim, hid_dim)),  "b1": b(ks[1], hid_dim),
        "w2": w(ks[2], (hid_dim, hid_dim)), "b2": b(ks[3], hid_dim),
        "w3": w(ks[4], (hid_dim, out_dim)), "b3": b(ks[5], out_dim),
    }


if __name__ == "__main__":
    key = jax.random.PRNGKey(0)
    kx, kp = jax.random.split(key, 2)

    num_graphs = 2            # "batch" = 2 graphs
    nodes_per_graph = 8       # "seq"   = 8 nodes per graph
    n = num_graphs * nodes_per_graph
    in_dim, hid_dim, out_dim = 128, 256, 128

    x_feat = jax.random.normal(kx, (n, in_dim), jnp.float32)
    batch = jnp.repeat(jnp.arange(num_graphs, dtype=jnp.int32), nodes_per_graph)
    params = init_params(kp, in_dim, hid_dim, out_dim)

    out = structdnn_forward(x_feat, batch, params, num_graphs,
                            node_tile=256, num_splits=2)
    out = jax.block_until_ready(out)

    ref = structdnn_reference(x_feat, batch, params, num_graphs)
    assert out.shape == (num_graphs, out_dim), out.shape
    assert bool(jnp.all(jnp.isfinite(out)))
    assert bool(jnp.all(out >= 0.0))  # ReLU precedes the max pool
    assert bool(jnp.allclose(out, ref, rtol=5e-2, atol=2e-3)), \
        float(jnp.max(jnp.abs(out - ref)))
    print("KERNEL_OK")
</pallas_src>

<mosaic_0001>
module attributes {stable_mosaic.version = 11 : i64} {
  func.func @structdnn_kernel(%arg0: i32, %arg1: i32, %arg2: memref<256x128xbf16, #tpu.memory_space<vmem>>, %arg3: memref<256x1xi32, #tpu.memory_space<vmem>>, %arg4: memref<128x256xbf16, #tpu.memory_space<vmem>>, %arg5: memref<1x256xf32, #tpu.memory_space<vmem>>, %arg6: memref<256x256xbf16, #tpu.memory_space<vmem>>, %arg7: memref<1x256xf32, #tpu.memory_space<vmem>>, %arg8: memref<256x128xbf16, #tpu.memory_space<vmem>>, %arg9: memref<1x128xf32, #tpu.memory_space<vmem>>, %arg10: memref<1x2x128xf32, #tpu.memory_space<vmem>>) attributes {dimension_semantics = [#tpu.dimension_semantics<parallel>, #tpu.dimension_semantics<arbitrary>], iteration_bounds = array<i64: 2, 1>, scalar_prefetch = 0 : i64, scratch_operands = 0 : i64, tpu.core_type = #tpu.core_type<tc>, window_params = [{transform_indices = @transform_0, window_bounds = array<i64: 256, 128>}, {transform_indices = @transform_1, window_bounds = array<i64: 256, 1>}, {pipeline_mode = #tpu.pipeline_mode<synchronous>, transform_indices = @transform_2, window_bounds = array<i64: 128, 256>}, {pipeline_mode = #tpu.pipeline_mode<synchronous>, transform_indices = @transform_3, window_bounds = array<i64: 1, 256>}, {pipeline_mode = #tpu.pipeline_mode<synchronous>, transform_indices = @transform_4, window_bounds = array<i64: 256, 256>}, {pipeline_mode = #tpu.pipeline_mode<synchronous>, transform_indices = @transform_5, window_bounds = array<i64: 1, 256>}, {pipeline_mode = #tpu.pipeline_mode<synchronous>, transform_indices = @transform_6, window_bounds = array<i64: 256, 128>}, {pipeline_mode = #tpu.pipeline_mode<synchronous>, transform_indices = @transform_7, window_bounds = array<i64: 1, 128>}, {transform_indices = @transform_8, window_bounds = array<i64: 1, 2, 128>}]} {
    %c0_i32 = arith.constant 0 : i32
    %0 = arith.cmpi eq, %arg1, %c0_i32 : i32
    %1 = arith.extui %0 : i1 to i32
    %c0_i32_0 = arith.constant 0 : i32
    %2 = arith.cmpi ne, %1, %c0_i32_0 : i32
    scf.if %2 {
      %cst_32 = arith.constant -3.40282347E+38 : f32
      %49 = vector.broadcast %cst_32 : f32 to vector<1x2x128xf32>
      %c0_33 = arith.constant 0 : index
      %c0_34 = arith.constant 0 : index
      %c0_35 = arith.constant 0 : index
      %50 = vector.load %arg10[%c0_33, %c0_34, %c0_35] : memref<1x2x128xf32, #tpu.memory_space<vmem>>, vector<1x2x128xf32>
      tpu.vector_store %arg10[%c0_33, %c0_34, %c0_35], %49 {strides = array<i32>} : memref<1x2x128xf32, #tpu.memory_space<vmem>>, vector<1x2x128xf32>,
    } else {
    }
    %c0 = arith.constant 0 : index
    %c0_1 = arith.constant 0 : index
    %3 = vector.load %arg2[%c0, %c0_1] : memref<256x128xbf16, #tpu.memory_space<vmem>>, vector<256x128xbf16>
    %c0_2 = arith.constant 0 : index
    %c0_3 = arith.constant 0 : index
    %4 = vector.load %arg4[%c0_2, %c0_3] : memref<128x256xbf16, #tpu.memory_space<vmem>>, vector<128x256xbf16>
    %cst = arith.constant dense<0.000000e+00> : vector<256x256xf32>
    %5 = tpu.matmul %3, %4, %cst {dimension_numbers = #tpu.dot_dimension_numbers<[1], [0], [0], [1], [0, 0, 1, 1], [], []>} : vector<256x128xbf16>, vector<128x256xbf16>, vector<256x256xf32> -> vector<256x256xf32>
    %c0_4 = arith.constant 0 : index
    %c0_5 = arith.constant 0 : index
    %6 = vector.load %arg5[%c0_4, %c0_5] : memref<1x256xf32, #tpu.memory_space<vmem>>, vector<1x256xf32>
    %7 = vector.broadcast %6 : vector<1x256xf32> to vector<256x256xf32>
    %8 = arith.addf %5, %7 : vector<256x256xf32>
    %cst_6 = arith.constant 0.000000e+00 : f32
    %9 = vector.broadcast %cst_6 : f32 to vector<256x256xf32>
    %10 = arith.maximumf %8, %9 : vector<256x256xf32>
    %11 = arith.truncf %10 : vector<256x256xf32> to vector<256x256xbf16>
    %c0_7 = arith.constant 0 : index
    %c0_8 = arith.constant 0 : index
    %12 = vector.load %arg6[%c0_7, %c0_8] : memref<256x256xbf16, #tpu.memory_space<vmem>>, vector<256x256xbf16>
    %cst_9 = arith.constant dense<0.000000e+00> : vector<256x256xf32>
    %13 = tpu.matmul %11, %12, %cst_9 {dimension_numbers = #tpu.dot_dimension_numbers<[1], [0], [0], [1], [0, 0, 1, 1], [], []>} : vector<256x256xbf16>, vector<256x256xbf16>, vector<256x256xf32> -> vector<256x256xf32>
    %c0_10 = arith.constant 0 : index
    %c0_11 = arith.constant 0 : index
    %14 = vector.load %arg7[%c0_10, %c0_11] : memref<1x256xf32, #tpu.memory_space<vmem>>, vector<1x256xf32>
    %15 = vector.broadcast %14 : vector<1x256xf32> to vector<256x256xf32>
    %16 = arith.addf %13, %15 : vector<256x256xf32>
    %cst_12 = arith.constant 0.000000e+00 : f32
    %17 = vector.broadcast %cst_12 : f32 to vector<256x256xf32>
    %18 = arith.maximumf %16, %17 : vector<256x256xf32>
    %19 = arith.truncf %18 : vector<256x256xf32> to vector<256x256xbf16>
    %c0_13 = arith.constant 0 : index
    %c0_14 = arith.constant 0 : index
    %20 = vector.load %arg8[%c0_13, %c0_14] : memref<256x128xbf16, #tpu.memory_space<vmem>>, vector<256x128xbf16>
    %cst_15 = arith.constant dense<0.000000e+00> : vector<256x128xf32>
    %21 = tpu.matmul %19, %20, %cst_15 {dimension_numbers = #tpu.dot_dimension_numbers<[1], [0], [0], [1], [0, 0, 1, 1], [], []>} : vector<256x256xbf16>, vector<256x128xbf16>, vector<256x128xf32> -> vector<256x128xf32>
    %c0_16 = arith.constant 0 : index
    %c0_17 = arith.constant 0 : index
    %22 = vector.load %arg9[%c0_16, %c0_17] : memref<1x128xf32, #tpu.memory_space<vmem>>, vector<1x128xf32>
    %23 = vector.broadcast %22 : vector<1x128xf32> to vector<256x128xf32>
    %24 = arith.addf %21, %23 : vector<256x128xf32>
    %cst_18 = arith.constant 0.000000e+00 : f32
    %25 = vector.broadcast %cst_18 : f32 to vector<256x128xf32>
    %26 = arith.maximumf %24, %25 : vector<256x128xf32>
    %c0_19 = arith.constant 0 : index
    %c0_20 = arith.constant 0 : index
    %27 = vector.load %arg3[%c0_19, %c0_20] : memref<256x1xi32, #tpu.memory_space<vmem>>, vector<256x1xi32>
    %c0_i32_21 = arith.constant 0 : i32
    %28 = vector.broadcast %c0_i32_21 : i32 to vector<256x1xi32>
    %29 = arith.cmpi eq, %27, %28 : vector<256x1xi32>
    %cst_22 = arith.constant -3.40282347E+38 : f32
    %30 = vector.shape_cast %29 : vector<256x1xi1> to vector<256x1xi1>
    %31 = vector.broadcast %30 : vector<256x1xi1> to vector<256x128xi1>
    %32 = vector.broadcast %cst_22 : f32 to vector<256x128xf32>
    %33 = arith.select %31, %26, %32 : vector<256x128xi1>, vector<256x128xf32>
    %cst_23 = arith.constant dense<0xFF800000> : vector<128xf32>
    %34 = vector.multi_reduction <maximumf>, %33, %cst_23 [0] : vector<256x128xf32> to vector<128xf32>
    %35 = vector.shape_cast %34 : vector<128xf32> to vector<1x128xf32>
    %c1_i32 = arith.constant 1 : i32
    %36 = vector.broadcast %c1_i32 : i32 to vector<256x1xi32>
    %37 = arith.cmpi eq, %27, %36 : vector<256x1xi32>
    %cst_24 = arith.constant -3.40282347E+38 : f32
    %38 = vector.shape_cast %37 : vector<256x1xi1> to vector<256x1xi1>
    %39 = vector.broadcast %38 : vector<256x1xi1> to vector<256x128xi1>
    %40 = vector.broadcast %cst_24 : f32 to vector<256x128xf32>
    %41 = arith.select %39, %26, %40 : vector<256x128xi1>, vector<256x128xf32>
    %cst_25 = arith.constant dense<0xFF800000> : vector<128xf32>
    %42 = vector.multi_reduction <maximumf>, %41, %cst_25 [0] : vector<256x128xf32> to vector<128xf32>
    %43 = vector.shape_cast %42 : vector<128xf32> to vector<1x128xf32>
    %44 = tpu.concatenate %35, %43 in 0 : vector<1x128xf32>, vector<1x128xf32> -> vector<2x128xf32>
    %c0_26 = arith.constant 0 : index
    %c0_27 = arith.constant 0 : index
    %c0_28 = arith.constant 0 : index
    %45 = vector.load %arg10[%c0_26, %c0_27, %c0_28] : memref<1x2x128xf32, #tpu.memory_space<vmem>>, vector<1x2x128xf32>
    %46 = vector.shape_cast %44 : vector<2x128xf32> to vector<1x2x128xf32>
    %47 = arith.maximumf %45, %46 : vector<1x2x128xf32>
    %c0_29 = arith.constant 0 : index
    %c0_30 = arith.constant 0 : index
    %c0_31 = arith.constant 0 : index
    %48 = vector.load %arg10[%c0_29, %c0_30, %c0_31] : memref<1x2x128xf32, #tpu.memory_space<vmem>>, vector<1x2x128xf32>
    tpu.vector_store %arg10[%c0_29, %c0_30, %c0_31], %47 {strides = array<i32>} : memref<1x2x128xf32, #tpu.memory_space<vmem>>, vector<1x2x128xf32>,
    return
  }
  func.func @transform_0(%arg0: i32, %arg1: i32) -> (i32, i32) {
    %c1_i32 = arith.constant 1 : i32
    %0 = arith.muli %arg0, %c1_i32 : i32
    %1 = arith.addi %0, %arg1 : i32
    %c0_i32 = arith.constant 0 : i32
    %c0_i32_0 = arith.constant 0 : i32
    return %1, %c0_i32 : i32, i32
  }
  func.func @transform_1(%arg0: i32, %arg1: i32) -> (i32, i32) {
    %c1_i32 = arith.constant 1 : i32
    %0 = arith.muli %arg0, %c1_i32 : i32
    %1 = arith.addi %0, %arg1 : i32
    %c0_i32 = arith.constant 0 : i32
    %c0_i32_0 = arith.constant 0 : i32
    return %1, %c0_i32 : i32, i32
  }
  func.func @transform_2(%arg0: i32, %arg1: i32) -> (i32, i32) {
    %c0_i32 = arith.constant 0 : i32
    %c0_i32_0 = arith.constant 0 : i32
    %c0_i32_1 = arith.constant 0 : i32
    return %c0_i32, %c0_i32_0 : i32, i32
  }
  func.func @transform_3(%arg0: i32, %arg1: i32) -> (i32, i32) {
    %c0_i32 = arith.constant 0 : i32
    %c0_i32_0 = arith.constant 0 : i32
    %c0_i32_1 = arith.constant 0 : i32
    return %c0_i32, %c0_i32_0 : i32, i32
  }
  func.func @transform_4(%arg0: i32, %arg1: i32) -> (i32, i32) {
    %c0_i32 = arith.constant 0 : i32
    %c0_i32_0 = arith.constant 0 : i32
    %c0_i32_1 = arith.constant 0 : i32
    return %c0_i32, %c0_i32_0 : i32, i32
  }
  func.func @transform_5(%arg0: i32, %arg1: i32) -> (i32, i32) {
    %c0_i32 = arith.constant 0 : i32
    %c0_i32_0 = arith.constant 0 : i32
    %c0_i32_1 = arith.constant 0 : i32
    return %c0_i32, %c0_i32_0 : i32, i32
  }
  func.func @transform_6(%arg0: i32, %arg1: i32) -> (i32, i32) {
    %c0_i32 = arith.constant 0 : i32
    %c0_i32_0 = arith.constant 0 : i32
    %c0_i32_1 = arith.constant 0 : i32
    return %c0_i32, %c0_i32_0 : i32, i32
  }
  func.func @transform_7(%arg0: i32, %arg1: i32) -> (i32, i32) {
    %c0_i32 = arith.constant 0 : i32
    %c0_i32_0 = arith.constant 0 : i32
    %c0_i32_1 = arith.constant 0 : i32
    return %c0_i32, %c0_i32_0 : i32, i32
  }
  func.func @transform_8(%arg0: i32, %arg1: i32) -> (i32, i32, i32) {
    %c0_i32 = arith.constant 0 : i32
    %c0_i32_0 = arith.constant 0 : i32
    %c0_i32_1 = arith.constant 0 : i32
    return %arg0, %c0_i32, %c0_i32_0 : i32, i32, i32
  }
}

</mosaic_0001>

<bundles_post_ra>
// kernel: tpu_custom_call.1
= control target key start
LH: loop header
LB: loop body
LE: loop exit
PB: predicated region body
PF: predicated region fallthrough
CT: control target
= control target key end

     0   :  { %s4339_s0 = inlined_call_operand.vmem [shape: bf16[512,128], index: 0, kind: input, shape index: {}]   ;;  %s4340_s1 = inlined_call_operand.vmem [shape: s32[512,1], index: 1, kind: input, shape index: {}]   ;;  %s4341_s2 = inlined_call_operand.hbm [shape: bf16[128,256], index: 2, kind: input, shape index: {}]   ;;  %s4342_s3 = inlined_call_operand.vmem [shape: f32[1,256], index: 3, kind: input, shape index: {}]   ;;  %s4343_s4 = inlined_call_operand.vmem [shape: bf16[256,256], index: 4, kind: input, shape index: {}]   ;;  %s4344_s5 = inlined_call_operand.vmem [shape: f32[1,256], index: 5, kind: input, shape index: {}]   ;;  %s4345_s6 = inlined_call_operand.hbm [shape: bf16[256,128], index: 6, kind: input, shape index: {}]   ;;  %s4346_s7 = inlined_call_operand.vmem [shape: f32[1,128], index: 7, kind: input, shape index: {}]   ;;  %s4347_s8 = inlined_call_operand.hbm [shape: f32[2,2,128], index: 8, kind: output, shape index: {}]  }
   0x1   :  { %4354 = sst [smem:[#allocation17_spill]] %s4341_s2 }
   0x2   :  { %13 = vsyncpa [#allocation3], 0 }
   0x3   :  { %14 = vsyncpa [#allocation6], 0 }
   0x4   :  { %15 = vsyncpa [#allocation4], 0 }
   0x5   :  { %17 = vsyncpa [#allocation4 + $0x1], 0  ;;  %s3270_s27 = smov 0   ;;  %s3272_s28 = smov 0  }
   0x6   :  { %s3274_s29 = smov 0   ;;  %s3276_s30 = smov 0  }
   0x7   :  { %s3278_s9 = smov 0   ;;  %s3280_s10 = smov 0  }
   0x8 LB: > { %s2565_s11 = sadd.s32 4294967295, %s3215_s10   ;;  %s2566_s12 = sadd.s32 4294967294, %s3215_s10   ;;  %s3215_s10 = sphi %s3280_s10, %s23_s10   ;;  %s3211_s9 = sphi %s3278_s9, %s4376_s9   ;;  %s3207_s30 = sphi %s3276_s30, %s4375_s30   ;;  %s3203_s29 = sphi %s3274_s29, %s4374_s29   ;;  %s3199_s28 = sphi %s3272_s28, %s4373_s28   ;;  %s3195_s27 = sphi %s3270_s27, %s4372_s27  }
   0x9   : > { %s35_s13 = sadd.s32 1, %s3211_s9  ;;  %s224_s14 = sadd.s32 1, %s3203_s29 }
   0xa   : > { %p37_p0 = scmp.ge.s32.totalorder %s35_s13, 2  ;;  %p234_p1 = scmp.ne.s32.totalorder %s3203_s29, %s3199_s28 }
   0xb   : > { %p235_p2 = scmp.eq.s32.totalorder %s2565_s11, 1  ;;  %p240_p3 = scmp.ne.s32.totalorder %s3199_s28, %s3195_s27 }
   0xc   : > { %s4378_s13 = smov (%p37_p0, %s35_s13), 0  ;;  %p241_p5 = scmp.eq.s32.totalorder %s2566_s12, 1 }
   0xd   : > { %4355 = sst [smem:[#allocation11_spill]] %s4378_s13  ;;  %p3310_p4 = por %p235_p2, %p234_p1 }
   0xe   : > { %s221_s16 = ssub.s32 %s3211_s9, %s4378_s13  ;;  %p2567_p6 = scmp.ge.s32.totalorder %s3215_s10, 1 }
   0xf   : > { %p222_p7 = scmp.eq.s32.totalorder %s221_s16, 0  ;;  %p3317_p8 = por %p241_p5, %p240_p3 }
  0x10   : > { %p248_p9 = scmp.lt.s32.totalorder %s3215_s10, 3  ;;  %p3329_p11 = scmp.eq.s32.totalorder %s2565_s11, 0 }
  0x11   : > { %s3323_s18 = scalar_select %p222_p7, %s3203_s29, %s224_s14  }
  0x12   : > { %p3325_p10 = pnand %p2567_p6, %p248_p9  ;;  %s4360_s2 = sld [smem:[#allocation17_spill]] }
  0x13   : > { %s3217_s24 = smov [#allocation2]   ;;  %s282_s11 = sshll.u32 %s4345_s6, 4  ;;  %s283_s11 = int_to_ptr.hbm [resolvable:$true] %s282_s11 }
  0x14   : > { %p2993_p12 = pneg %p3325_p10  ;;  %s261_s25 = sshll.u32 %s3217_s24, 4  ;;  %s262_s25 = int_to_ptr.vmem [resolvable:$true] %s261_s25 }
  0x15   : > { %s3218_s14 = smov 128   ;;  %s3219_s16 = smov 8  }
  0x16   : > { %p2994_p13 = pnand %p3329_p11, %p2993_p12  ;;  %s3220_s13 = smov [#allocation5]  }
  0x17   : > { %s284_s21 = sshll.u32 %s3220_s13, 4  ;;  %s3221_s22 = smov 64   ;;  %s285_s21 = int_to_ptr.vmem [resolvable:$true] %s284_s21 }
  0x18   : > { %s259_s23 = sshll.u32 %s4360_s2, 4  ;;  %s3222_s2 = smov 4   ;;  %s260_s23 = int_to_ptr.hbm [resolvable:$true] %s259_s23 }
  0x19   : > { %2996 = dma.hbm_to_vmem [thread:$0]  (!%p2994_p13), %s260_s23, 2048, %s262_s25, [#allocation3], %s3218_s14, %s3218_s14, %s3219_s16  }
  0x1a   : > { %2999 = dma.hbm_to_vmem [thread:$0]  (!%p2994_p13), %s283_s11, 2048, %s285_s21, [#allocation6], %s3221_s22, %s3221_s22, %s3222_s2  }
  0x1b   : > { %325 = sbr.rel (%p3325_p10) target bundleno = 872 (0x368), region = 52 }
  0x20   : > { %3182 = dma.done.wait (%p3329_p11), [#allocation3], 2048  }
  0x21   : > { %3184 = vsyncadd (%p3329_p11), [#allocation3], 4294965248 }
  0x22   : > { %3186 = dma.done.wait (%p3329_p11), [#allocation6], 2048  }
  0x23   : > { %3188 = vsyncadd (%p3329_p11), [#allocation6], 4294965248  ;;  %v2701_v0 = vld [vmem:[#allocation2 + $0x70] sm:$0xf]  ;;  %v2934_v1 = vld [vmem:[#allocation2 + $0x74] sm:$0xf0] }
  0x24   : > { %v2933_v2 = vld [vmem:[#allocation2 + $0x74] sm:$0xf]  ;;  %v2702_v3 = vor.u32 %v2934_v1, %v2701_v0  ;;  %v2703_v4 = vld [vmem:[#allocation2 + $0x78] sm:$0xf0]  ;;  %v2693_v5 = vld [vmem:[#allocation2 + $0x60] sm:$0xf] }
  0x25   : > { %v2932_v6 = vld [vmem:[#allocation2 + $0x64] sm:$0xf0]  ;;  %v2706_v7 = vor.u32 %v2933_v2, %v2703_v4  ;;  %v2931_v8 = vld [vmem:[#allocation2 + $0x64] sm:$0xf]  ;;  %v2695_v9 = vld [vmem:[#allocation2 + $0x68] sm:$0xf0] }
  0x26   : > { %623 = vmatpush.bf16.msra.mxu0 %v2702_v3  ;;  %v2694_v10 = vor.u32 %v2932_v6, %v2693_v5  ;;  %v2698_v11 = vor.u32 %v2931_v8, %v2695_v9  ;;  %v2685_v12 = vld [vmem:[#allocation2 + $0x50] sm:$0xf]  ;;  %v2930_v13 = vld [vmem:[#allocation2 + $0x54] sm:$0xf0]  ;;  %v2929_v14 = vld [vmem:[#allocation2 + $0x54] sm:$0xf] }
  0x27   : > { %712 = vmatpush.bf16.msra.mxu1 %v2706_v7  ;;  %v2687_v15 = vld [vmem:[#allocation2 + $0x58] sm:$0xf0]  ;;  %v2686_v16 = vor.u32 %v2930_v13, %v2685_v12  ;;  %v2677_v18 = vld [vmem:[#allocation2 + $0x40] sm:$0xf]  ;;  %v2928_v19 = vld [vmem:[#allocation2 + $0x44] sm:$0xf0] }
  0x28   : > { %v2690_v17 = vor.u32 %v2929_v14, %v2687_v15  ;;  %v2927_v20 = vld [vmem:[#allocation2 + $0x44] sm:$0xf]  ;;  %v2679_v21 = vld [vmem:[#allocation2 + $0x48] sm:$0xf0]  ;;  %v2678_v22 = vor.u32 %v2928_v19, %v2677_v18  ;;  %s2575_s2 = sshll.u32 %s3207_s30, 5  ;;  %s369_s12 = sand.u32 1, %s3199_s28  }
  0x29   : > { %v2682_v23 = vor.u32 %v2927_v20, %v2679_v21  ;;  %v2669_v24 = vld [vmem:[#allocation2 + $0x30] sm:$0xf]  ;;  %v2926_v25 = vld [vmem:[#allocation2 + $0x34] sm:$0xf0]  ;;  %v2925_v26 = vld [vmem:[#allocation2 + $0x34] sm:$0xf] }
  0x2a   : > { %624 = vmatpush.bf16.msra.mxu0 %v2694_v10  ;;  %v2671_v27 = vld [vmem:[#allocation2 + $0x38] sm:$0xf0]  ;;  %v2670_v28 = vor.u32 %v2926_v25, %v2669_v24  ;;  %p374_p0 = scmp.lt.s32.totalorder %s2575_s2, 63  ;;  %v2661_v30 = vld [vmem:[#allocation2 + $0x20] sm:$0xf]  ;;  %s2574_s11 = sshll.u32 %s369_s12, 1 }
  0x2b   : > { %713 = vmatpush.bf16.msra.mxu1 %v2698_v11  ;;  %v2674_v29 = vor.u32 %v2925_v26, %v2671_v27  ;;  %v2924_v31 = vld [vmem:[#allocation2 + $0x24] sm:$0xf0]  ;;  %v2923_v32 = vld [vmem:[#allocation2 + $0x24] sm:$0xf]  ;;  %v2663_v33 = vld [vmem:[#allocation2 + $0x28] sm:$0xf0] }
  0x2c   : > { %v2662_v34 = vor.u32 %v2924_v31, %v2661_v30  ;;  %s4380_s2 = smov (!%p374_p0, %s2575_s2), 63  ;;  %v2666_v35 = vor.u32 %v2923_v32, %v2663_v33  ;;  %v2653_v36 = vld [vmem:[#allocation2 + $0x10] sm:$0xf]  ;;  %v2922_v37 = vld [vmem:[#allocation2 + $0x14] sm:$0xf0]  ;;  %s4280_s14 = scalar_lea.vmem [#allocation7], %s2574_s11 }
  0x2d   : > { %v2921_v38 = vld [vmem:[#allocation2 + $0x14] sm:$0xf]  ;;  %v2655_v39 = vld [vmem:[#allocation2 + $0x18] sm:$0xf0]  ;;  %v2654_v40 = vor.u32 %v2922_v37, %v2653_v36  ;;  %s2576_s13 = sshll.u32 %s4380_s2, 2  ;;  %s2578_s20 = sshll.u32 %s4380_s2, 3 }
  0x2e   : > { %625 = vmatpush.bf16.msra.mxu0 %v2686_v16  ;;  %v2658_v41 = vor.u32 %v2921_v38, %v2655_v39  ;;  %v2645_v42 = vld [vmem:[#allocation2] sm:$0xf]  ;;  %v2920_v43 = vld [vmem:[#allocation2 + $0x4] sm:$0xf0]  ;;  %v2919_v44 = vld [vmem:[#allocation2 + $0x4] sm:$0xf]  ;;  %s3372_s21 = scalar_lea.vmem %s4339_s0, %s2576_s13  ;;  %s3702_s25 = scalar_lea.vmem %s4340_s1, %s2578_s20 }
  0x2f   : > { %714 = vmatpush.bf16.msra.mxu1 %v2690_v17  ;;  %v2647_v45 = vld [vmem:[#allocation2 + $0x8] sm:$0xf0]  ;;  %v2949_v46 = vld [vmem:[%s4343_s4 + $0x74] sm:$0xf]  ;;  %v2767_v47 = vld [vmem:[%s4343_s4 + $0x78] sm:$0xf0]  ;;  %v2646_v50 = vor.u32 %v2920_v43, %v2645_v42 }
  0x30   : > { %v2965_v48 = vld [vmem:[%s4343_s4 + $0xf4] sm:$0xf]  ;;  %v2831_v49 = vld [vmem:[%s4343_s4 + $0xf8] sm:$0xf0]  ;;  %v2650_v51 = vor.u32 %v2919_v44, %v2647_v45  ;;  %v2770_v52 = vor.u32 %v2949_v46, %v2767_v47  ;;  %v2903_v54 = vld [vmem:[%s3372_s21] sm:$0xff]  ;;  %s2900_s16 = sshll.u32 %s3207_s30, 1 }
  0x31   : > { %v2834_v53 = vor.u32 %v2965_v48, %v2831_v49  ;;  %v2947_v55 = vld [vmem:[%s4343_s4 + $0x64] sm:$0xf]  ;;  %v2759_v56 = vld [vmem:[%s4343_s4 + $0x68] sm:$0xf0]  ;;  %v2905_v62 = vld [vmem:[%s3372_s21 + $0x10] sm:$0xff]  ;;  %s2461_s13 = sshll.u32 %s4280_s14, 4  ;;  %s2462_s13 = int_to_ptr.vmem [resolvable:$true] %s2461_s13 }
  0x32   : > { %626 = vmatpush.bf16.msra.mxu0 %v2678_v22  ;;  %v2963_v57 = vld [vmem:[%s4343_s4 + $0xe4] sm:$0xf]  ;;  %v2762_v58 = vor.u32 %v2947_v55, %v2759_v56  ;;  %v2823_v59 = vld [vmem:[%s4343_s4 + $0xe8] sm:$0xf0]  ;;  %v2945_v63 = vld [vmem:[%s4343_s4 + $0x54] sm:$0xf] }
  0x33   : > { %715 = vmatpush.bf16.msra.mxu1 %v2682_v23  ;;  %v2826_v60 = vor.u32 %v2963_v57, %v2823_v59  ;;  %v2904_v61 = vld [vmem:[%s3372_s21 + $0x8] sm:$0xff]  ;;  %v2751_v0 = vld [vmem:[%s4343_s4 + $0x58] sm:$0xf0]  ;;  %v2961_v1 = vld [vmem:[%s4343_s4 + $0xd4] sm:$0xf]  ;;  %s2449_s30 = scalar_lea.sflag [#allocation4], %s369_s12 }
  0x34   : > { %v2754_v2 = vor.u32 %v2945_v63, %v2751_v0  ;;  %v2815_v3 = vld [vmem:[%s4343_s4 + $0xd8] sm:$0xf0]  ;;  %v2907_v6 = vld [vmem:[%s3372_s21 + $0x20] sm:$0xff]  ;;  %v2743_v8 = vld [vmem:[%s4343_s4 + $0x48] sm:$0xf0]  ;;  %s3149_s26 = scalar_lea.hbm %s4347_s8, 4 }
  0x35   : > { %v2818_v4 = vor.u32 %v2961_v1, %v2815_v3  ;;  %v2906_v5 = vld [vmem:[%s3372_s21 + $0x18] sm:$0xff]  ;;  %v2943_v7 = vld [vmem:[%s4343_s4 + $0x44] sm:$0xf]  ;;  %v2807_v11 = vld [vmem:[%s4343_s4 + $0xc8] sm:$0xf0] }
  0x36   : > { %627 = vmatpush.bf16.msra.mxu0 %v2670_v28  ;;  %v2959_v9 = vld [vmem:[%s4343_s4 + $0xc4] sm:$0xf]  ;;  %v2746_v10 = vor.u32 %v2943_v7, %v2743_v8  ;;  %v2765_v12 = vld [vmem:[%s4343_s4 + $0x70] sm:$0xf]  ;;  %v2950_v13 = vld [vmem:[%s4343_s4 + $0x74] sm:$0xf0] }
  0x37   : > { %716 = vmatpush.bf16.msra.mxu1 %v2674_v29  ;;  %v2810_v14 = vor.u32 %v2959_v9, %v2807_v11  ;;  %v2766_v15 = vor.u32 %v2950_v13, %v2765_v12  ;;  %v2829_v16 = vld [vmem:[%s4343_s4 + $0xf0] sm:$0xf]  ;;  %v2966_v17 = vld [vmem:[%s4343_s4 + $0xf4] sm:$0xf0]  ;;  %v2908_v19 = vld [vmem:[%s3372_s21 + $0x28] sm:$0xff] }
  0x38   : > { %v2830_v18 = vor.u32 %v2966_v17, %v2829_v16  ;;  %v2757_v20 = vld [vmem:[%s4343_s4 + $0x60] sm:$0xf]  ;;  %v2948_v21 = vld [vmem:[%s4343_s4 + $0x64] sm:$0xf0]  ;;  %v2749_v26 = vld [vmem:[%s4343_s4 + $0x50] sm:$0xf] }
  0x39   : > { %1095 = vmatpush.bf16.msra.mxu2 %v2766_v15  ;;  %v2821_v22 = vld [vmem:[%s4343_s4 + $0xe0] sm:$0xf]  ;;  %v2758_v23 = vor.u32 %v2948_v21, %v2757_v20  ;;  %v2964_v24 = vld [vmem:[%s4343_s4 + $0xe4] sm:$0xf0]  ;;  %v2946_v27 = vld [vmem:[%s4343_s4 + $0x54] sm:$0xf0] }
  0x3a   : > { %628 = vmatpush.bf16.msra.mxu0 %v2662_v34  ;;  %1184 = vmatpush.bf16.msra.mxu3 %v2830_v18  ;;  %v2822_v25 = vor.u32 %v2964_v24, %v2821_v22  ;;  %v2813_v28 = vld [vmem:[%s4343_s4 + $0xd0] sm:$0xf]  ;;  %v2750_v29 = vor.u32 %v2946_v27, %v2749_v26  ;;  %v2962_v30 = vld [vmem:[%s4343_s4 + $0xd4] sm:$0xf0]  ;;  %v2741_v32 = vld [vmem:[%s4343_s4 + $0x40] sm:$0xf] }
  0x3b   : > { %717 = vmatpush.bf16.msra.mxu1 %v2666_v35  ;;  %v2814_v31 = vor.u32 %v2962_v30, %v2813_v28  ;;  %v2944_v33 = vld [vmem:[%s4343_s4 + $0x44] sm:$0xf0]  ;;  %v2805_v34 = vld [vmem:[%s4343_s4 + $0xc0] sm:$0xf]  ;;  %v2733_v38 = vld [vmem:[%s4343_s4 + $0x30] sm:$0xf] }
  0x3c   : > { %v2960_v35 = vld [vmem:[%s4343_s4 + $0xc4] sm:$0xf0]  ;;  %v2742_v36 = vor.u32 %v2944_v33, %v2741_v32  ;;  %v2942_v39 = vld [vmem:[%s4343_s4 + $0x34] sm:$0xf0]  ;;  %v2725_v45 = vld [vmem:[%s4343_s4 + $0x20] sm:$0xf] }
  0x3d   : > { %1096 = vmatpush.bf16.msra.mxu2 %v2758_v23  ;;  %v2806_v37 = vor.u32 %v2960_v35, %v2805_v34  ;;  %v2734_v42 = vor.u32 %v2942_v39, %v2733_v38  ;;  %v2958_v43 = vld [vmem:[%s4343_s4 + $0xb4] sm:$0xf0]  ;;  %v2940_v46 = vld [vmem:[%s4343_s4 + $0x24] sm:$0xf0]  ;;  %v2789_v48 = vld [vmem:[%s4343_s4 + $0xa0] sm:$0xf] }
  0x3e   : > { %629 = vmatpush.bf16.msra.mxu0 %v2654_v40  ;;  %1185 = vmatpush.bf16.msra.mxu3 %v2822_v25  ;;  %v2797_v40 = vld [vmem:[%s4343_s4 + $0xb0] sm:$0xf]  ;;  %v2726_v47 = vor.u32 %v2940_v46, %v2725_v45  ;;  %v2956_v49 = vld [vmem:[%s4343_s4 + $0xa4] sm:$0xf0]  ;;  %v2799_v55 = vld [vmem:[%s4343_s4 + $0xb8] sm:$0xf0] }
  0x3f   : > { %718 = vmatpush.bf16.msra.mxu1 %v2658_v41  ;;  %v2909_v41 = vld [vmem:[%s3372_s21 + $0x30] sm:$0xff]  ;;  %v2798_v44 = vor.u32 %v2958_v43, %v2797_v40  ;;  %v2709_v63 = vld [vmem:[%s4343_s4] sm:$0xf]  ;;  %v2936_v0 = vld [vmem:[%s4343_s4 + $0x4] sm:$0xf0] }
  0x40   : > { %v2717_v57 = vld [vmem:[%s4343_s4 + $0x10] sm:$0xf]  ;;  %v2773_v1 = vld [vmem:[%s4343_s4 + $0x80] sm:$0xf]  ;;  %v2952_v3 = vld [vmem:[%s4343_s4 + $0x84] sm:$0xf0] }
  0x41   : > { %1097 = vmatpush.bf16.msra.mxu2 %v2750_v29  ;;  %v2781_v59 = vld [vmem:[%s4343_s4 + $0x90] sm:$0xf]  ;;  %v2982_v7 = vld [vmem:[#allocation5 + $0x78] sm:$0xff]  ;;  %v2911_v8 = vld [vmem:[%s3372_s21 + $0x40] sm:$0xff] }
  0x42   : > { %630 = vmatpush.bf16.msra.mxu0 %v2646_v50  ;;  %1186 = vmatpush.bf16.msra.mxu3 %v2814_v31  ;;  %v2941_v50 = vld [vmem:[%s4343_s4 + $0x34] sm:$0xf]  ;;  %v441_v9 = vld [vmem:[%s4342_s3] sm:$0x3]  ;;  %v2727_v15 = vld [vmem:[%s4343_s4 + $0x28] sm:$0xf0] }
  0x43   : > { %719 = vmatpush.bf16.msra.mxu1 %v2650_v51  ;;  %v2735_v51 = vld [vmem:[%s4343_s4 + $0x38] sm:$0xf0]  ;;  %v3530_v12 = vperm.slane %v441_v9, 0  ;;  %v3532_v13 = vperm.slane %v441_v9, 1  ;;  %v2955_v17 = vld [vmem:[%s4343_s4 + $0xa4] sm:$0xf] }
  0x44   : > { %v2791_v18 = vld [vmem:[%s4343_s4 + $0xa8] sm:$0xf0]  ;;  %v2973_v34 = vld [vmem:[#allocation5 + $0x30] sm:$0xff] }
  0x45   : > { %631 = vmatmul.bf16.vlgmr.msra.gmra.mxu0 %v2903_v54  ;;  %1098 = vmatpush.bf16.msra.mxu2 %v2742_v36  ;;  %v2912_v32 = vld [vmem:[%s3372_s21 + $0x48] sm:$0xff]  ;;  %v2981_v36 = vld [vmem:[#allocation5 + $0x70] sm:$0xff] }
  0x46   : > { %1273 = vmatpush.bf16.msrb.mxu0 %v2770_v52  ;;  %720 = vmatmul.bf16.vlgmr.msra.gmra.mxu1 %v2903_v54  ;;  %v2790_v52 = vor.u32 %v2956_v49, %v2789_v48  ;;  %v2738_v54 = vor.u32 %v2941_v50, %v2735_v51  ;;  %v2913_v49 = vld [vmem:[%s3372_s21 + $0x50] sm:$0xff] }
  0x47   : > { %1362 = vmatpush.bf16.msrb.mxu1 %v2834_v53  ;;  %1187 = vmatpush.bf16.msra.mxu3 %v2806_v37  ;;  %v2957_v53 = vld [vmem:[%s4343_s4 + $0xb4] sm:$0xf] }
  0x48   : > { %v2802_v56 = vor.u32 %v2957_v53, %v2799_v55  ;;  %v2719_v53 = vld [vmem:[%s4343_s4 + $0x18] sm:$0xf0]  ;;  %v2953_v55 = vld [vmem:[%s4343_s4 + $0x94] sm:$0xf] }
  0x49   : > { %1099 = vmatpush.bf16.msra.mxu2 %v2734_v42 }
  0x4a   : > { %1274 = vmatpush.bf16.msrb.mxu0 %v2762_v58  ;;  %v2938_v58 = vld [vmem:[%s4343_s4 + $0x14] sm:$0xf0] }
  0x4b   : > { %1363 = vmatpush.bf16.msrb.mxu1 %v2826_v60  ;;  %1188 = vmatpush.bf16.msra.mxu3 %v2798_v44  ;;  %v2718_v60 = vor.u32 %v2938_v58, %v2717_v57 }
  0x4d   : > { %1100 = vmatpush.bf16.msra.mxu2 %v2726_v47 }
  0x4e   : > { %1275 = vmatpush.bf16.msrb.mxu0 %v2754_v2  ;;  %v2710_v2 = vor.u32 %v2936_v0, %v2709_v63 }
  0x4f   : > { %1364 = vmatpush.bf16.msrb.mxu1 %v2818_v4  ;;  %1189 = vmatpush.bf16.msra.mxu3 %v2790_v52  ;;  %v2774_v4 = vor.u32 %v2952_v3, %v2773_v1  ;;  %v2937_v52 = vld [vmem:[%s4343_s4 + $0x14] sm:$0xf] }
  0x51   : > { %1101 = vmatpush.bf16.msra.mxu2 %v2718_v60 }
  0x52   : > { %1276 = vmatpush.bf16.msrb.mxu0 %v2746_v10 }
  0x53   : > { %1365 = vmatpush.bf16.msrb.mxu1 %v2810_v14  ;;  %v2939_v14 = vld [vmem:[%s4343_s4 + $0x24] sm:$0xf] }
  0x54   : > { %v2730_v16 = vor.u32 %v2939_v14, %v2727_v15 }
  0x55   : > { %636 = vmatmul.bf16.gmra.mxu0 %v2904_v61  ;;  %1102 = vmatpush.bf16.msra.mxu2 %v2710_v2 }
  0x56   : > { %725 = vmatmul.bf16.gmra.mxu1 %v2904_v61  ;;  %1277 = vmatpush.bf16.msrb.mxu0 %v2738_v54  ;;  %v2954_v61 = vld [vmem:[%s4343_s4 + $0x94] sm:$0xf0]  ;;  %v2722_v54 = vor.u32 %v2937_v52, %v2719_v53  ;;  %v2971_v52 = vld [vmem:[#allocation5 + $0x20] sm:$0xff] }
  0x57   : > { %1366 = vmatpush.bf16.msrb.mxu1 %v2802_v56  ;;  %v2783_v56 = vld [vmem:[%s4343_s4 + $0x98] sm:$0xf0] }
  0x58   : > { %v2786_v57 = vor.u32 %v2953_v55, %v2783_v56 }
  0x5a   : > { %1278 = vmatpush.bf16.msrb.mxu0 %v2730_v16 }
  0x5e   : > { %1279 = vmatpush.bf16.msrb.mxu0 %v2722_v54  ;;  %v2979_v54 = vld [vmem:[#allocation5 + $0x60] sm:$0xff] }
  0x65   : > { %641 = vmatmul.bf16.gmra.mxu0 %v2905_v62 }
  0x66   : > { %730 = vmatmul.bf16.gmra.mxu1 %v2905_v62  ;;  %v2782_v62 = vor.u32 %v2954_v61, %v2781_v59 }
  0x68   : > { %1190 = vmatpush.bf16.msra.mxu3 %v2782_v62 }
  0x6c   : > { %1191 = vmatpush.bf16.msra.mxu3 %v2774_v4 }
  0x70   : > { %1768 = vmatpush.bf16.msrb.mxu3 %v2982_v7 }
  0x74   : > { %1769 = vmatpush.bf16.msrb.mxu3 %v2981_v36 }
  0x75   : > { %646 = vmatmul.bf16.gmra.mxu0 %v2906_v5 }
  0x76   : > { %735 = vmatmul.bf16.gmra.mxu1 %v2906_v5  ;;  %v2910_v5 = vld [vmem:[%s3372_s21 + $0x38] sm:$0xff] }
  0x85   : > { %651 = vmatmul.bf16.gmra.mxu0 %v2907_v6 }
  0x86   : > { %740 = vmatmul.bf16.gmra.mxu1 %v2907_v6  ;;  %v2974_v6 = vld [vmem:[#allocation5 + $0x38] sm:$0xff] }
  0x87   : > { %1679 = vmatpush.bf16.msrb.mxu2 %v2974_v6  ;;  %v2914_v6 = vld [vmem:[%s3372_s21 + $0x58] sm:$0xff] }
  0x8b   : > { %1680 = vmatpush.bf16.msrb.mxu2 %v2973_v34  ;;  %v2775_v34 = vld [vmem:[%s4343_s4 + $0x88] sm:$0xf0] }
  0x95   : > { %656 = vmatmul.bf16.gmra.mxu0 %v2908_v19 }
  0x96   : > { %745 = vmatmul.bf16.gmra.mxu1 %v2908_v19  ;;  %v2794_v19 = vor.u32 %v2955_v17, %v2791_v18 }
  0x98   : > { %1367 = vmatpush.bf16.msrb.mxu1 %v2794_v19 }
  0x9c   : > { %1368 = vmatpush.bf16.msrb.mxu1 %v2786_v57 }
  0xa5   : > { %661 = vmatmul.bf16.gmra.mxu0 %v2909_v41 }
  0xa6   : > { %750 = vmatmul.bf16.gmra.mxu1 %v2909_v41 }
  0xb5   : > { %666 = vmatmul.bf16.gmra.mxu0 %v2910_v5 }
  0xb6   : > { %755 = vmatmul.bf16.gmra.mxu1 %v2910_v5 }
  0xc2   : > { %v632_v10 = vpop.f32.mrf.mxu0 }
  0xc3   : > { %v721_v11 = vpop.f32.mrf.mxu1  ;;  %v633_v20 = vadd.f32 %v632_v10, %v3530_v12  ;;  %v2980_v10 = vld [vmem:[#allocation5 + $0x68] sm:$0xff] }
  0xc4   : > { %v722_v21 = vadd.f32 %v721_v11, %v3532_v13  ;;  %1770 = vmatpush.bf16.msrb.mxu3 %v2980_v10 }
  0xc5   : > { %671 = vmatmul.bf16.gmra.mxu0 %v2911_v8  ;;  %v801_v26 = vmax.f32 %v633_v20, 0.0 }
  0xc6   : > { %760 = vmatmul.bf16.gmra.mxu1 %v2911_v8  ;;  %v802_v28 = vmax.f32 %v722_v21, 0.0  ;;  %v2972_v8 = vld [vmem:[#allocation5 + $0x28] sm:$0xff] }
  0xc7   : > { %1681 = vmatpush.bf16.msrb.mxu2 %v2972_v8 }
  0xc8   : > { %1771 = vmatpush.bf16.msrb.mxu3 %v2979_v54 }
  0xca   : > { %v634_v22 = vpop.f32.mrf.mxu0 }
  0xcb   : > { %v635_v23 = vadd.f32 %v634_v22, %v3530_v12  ;;  %v723_v24 = vpop.f32.mrf.mxu1  ;;  %1682 = vmatpush.bf16.msrb.mxu2 %v2971_v52 }
  0xcc   : > { %v724_v25 = vadd.f32 %v723_v24, %v3532_v13 }
  0xcd   : > { %v803_v27 = vmax.f32 %v635_v23, 0.0 }
  0xce   : > { %v804_v29 = vmax.f32 %v724_v25, 0.0  ;;  %v2915_v25 = vld [vmem:[%s3372_s21 + $0x60] sm:$0xff] }
  0xcf   : > { %v3550_v30 = vpack.c.bf16 %v803_v27, %v801_v26 }
  0xd0   : > { %v3552_v31 = vpack.c.bf16 %v804_v29, %v802_v28  ;;  %v2935_v28 = vld [vmem:[%s4343_s4 + $0x4] sm:$0xf]  ;;  %v2711_v29 = vld [vmem:[%s4343_s4 + $0x8] sm:$0xf0] }
  0xd1   : > { %1103 = vmatmul.bf16.vlgmr.msra.gmra.mxu2 %v3550_v30 }
  0xd2   : > { %1192 = vmatmul.bf16.vlgmr.msra.gmra.mxu3 %v3552_v31  ;;  %v637_v33 = vpop.f32.mrf.mxu0 }
  0xd3   : > { %v726_v35 = vpop.f32.mrf.mxu1  ;;  %v638_v37 = vadd.f32 %v637_v33, %v3530_v12  ;;  %v2951_v33 = vld [vmem:[%s4343_s4 + $0x84] sm:$0xf] }
  0xd4   : > { %v727_v38 = vadd.f32 %v726_v35, %v3532_v13  ;;  %v2778_v35 = vor.u32 %v2951_v33, %v2775_v34 }
  0xd5   : > { %676 = vmatmul.bf16.gmra.mxu0 %v2912_v32  ;;  %v805_v43 = vmax.f32 %v638_v37, 0.0 }
  0xd6   : > { %765 = vmatmul.bf16.gmra.mxu1 %v2912_v32  ;;  %v806_v45 = vmax.f32 %v727_v38, 0.0  ;;  %v2714_v32 = vor.u32 %v2935_v28, %v2711_v29  ;;  %v2978_v28 = vld [vmem:[#allocation5 + $0x58] sm:$0xff] }
  0xd7   : > { %1369 = vmatpush.bf16.msrb.mxu1 %v2778_v35  ;;  %1772 = vmatpush.bf16.msrb.mxu3 %v2978_v28 }
  0xd8   : > { %1280 = vmatpush.bf16.msrb.mxu0 %v2714_v32 }
  0xda   : > { %v639_v39 = vpop.f32.mrf.mxu0 }
  0xdb   : > { %v640_v40 = vadd.f32 %v639_v39, %v3530_v12  ;;  %v728_v41 = vpop.f32.mrf.mxu1 }
  0xdc   : > { %v729_v42 = vadd.f32 %v728_v41, %v3532_v13 }
  0xdd   : > { %v807_v44 = vmax.f32 %v640_v40, 0.0 }
  0xde   : > { %v808_v46 = vmax.f32 %v729_v42, 0.0 }
  0xdf   : > { %v3561_v47 = vpack.c.bf16 %v807_v44, %v805_v43 }
  0xe0   : > { %v3563_v48 = vpack.c.bf16 %v808_v46, %v806_v45 }
  0xe1   : > { %1108 = vmatmul.bf16.gmra.mxu2 %v3561_v47 }
  0xe2   : > { %1197 = vmatmul.bf16.gmra.mxu3 %v3563_v48  ;;  %v642_v50 = vpop.f32.mrf.mxu0 }
  0xe3   : > { %v731_v51 = vpop.f32.mrf.mxu1  ;;  %v643_v58 = vadd.f32 %v642_v50, %v3530_v12  ;;  %v2916_v50 = vld [vmem:[%s3372_s21 + $0x68] sm:$0xff] }
  0xe4   : > { %v732_v59 = vadd.f32 %v731_v51, %v3532_v13 }
  0xe5   : > { %681 = vmatmul.bf16.gmra.mxu0 %v2913_v49  ;;  %v809_v0 = vmax.f32 %v643_v58, 0.0 }
  0xe6   : > { %770 = vmatmul.bf16.gmra.mxu1 %v2913_v49  ;;  %v810_v2 = vmax.f32 %v732_v59, 0.0 }
  0xea   : > { %v644_v60 = vpop.f32.mrf.mxu0 }
  0xeb   : > { %v645_v61 = vadd.f32 %v644_v60, %v3530_v12  ;;  %v733_v62 = vpop.f32.mrf.mxu1 }
  0xec   : > { %v734_v63 = vadd.f32 %v733_v62, %v3532_v13 }
  0xed   : > { %v811_v1 = vmax.f32 %v645_v61, 0.0 }
  0xee   : > { %v812_v3 = vmax.f32 %v734_v63, 0.0 }
  0xef   : > { %v3584_v4 = vpack.c.bf16 %v811_v1, %v809_v0 }
  0xf0   : > { %v3586_v5 = vpack.c.bf16 %v812_v3, %v810_v2  ;;  %v2917_v3 = vld [vmem:[%s3372_s21 + $0x70] sm:$0xff] }
  0xf1   : > { %1113 = vmatmul.bf16.gmra.mxu2 %v3584_v4 }
  0xf2   : > { %1202 = vmatmul.bf16.gmra.mxu3 %v3586_v5  ;;  %v647_v7 = vpop.f32.mrf.mxu0 }
  0xf3   : > { %v736_v9 = vpop.f32.mrf.mxu1  ;;  %v648_v11 = vadd.f32 %v647_v7, %v3530_v12 }
  0xf4   : > { %v737_v14 = vadd.f32 %v736_v9, %v3532_v13 }
  0xf5   : > { %686 = vmatmul.bf16.gmra.mxu0 %v2914_v6  ;;  %v813_v19 = vmax.f32 %v648_v11, 0.0 }
  0xf6   : > { %775 = vmatmul.bf16.gmra.mxu1 %v2914_v6  ;;  %v814_v21 = vmax.f32 %v737_v14, 0.0 }
  0xfa   : > { %v649_v15 = vpop.f32.mrf.mxu0 }
  0xfb   : > { %v650_v16 = vadd.f32 %v649_v15, %v3530_v12  ;;  %v738_v17 = vpop.f32.mrf.mxu1 }
  0xfc   : > { %v739_v18 = vadd.f32 %v738_v17, %v3532_v13 }
  0xfd   : > { %v815_v20 = vmax.f32 %v650_v16, 0.0 }
  0xfe   : > { %v816_v22 = vmax.f32 %v739_v18, 0.0 }
  0xff   : > { %v3595_v23 = vpack.c.bf16 %v815_v20, %v813_v19 }
 0x100   : > { %v3597_v24 = vpack.c.bf16 %v816_v22, %v814_v21  ;;  %v2918_v22 = vld [vmem:[%s3372_s21 + $0x78] sm:$0xff]  ;;  %s2459_s21 = scalar_lea.hbm %s4347_s8, %s2900_s16 }
 0x101   : > { %1118 = vmatmul.bf16.gmra.mxu2 %v3595_v23  ;;  %s2463_s20 = sshll.u32 %s2459_s21, 4  ;;  %s2464_s20 = int_to_ptr.hbm [resolvable:$true] %s2463_s20 }
 0x102   : > { %1207 = vmatmul.bf16.gmra.mxu3 %v3597_v24  ;;  %v652_v26 = vpop.f32.mrf.mxu0  ;;  %s3143_s23 = sshra.s32 %s2464_s20, 4  ;;  %s3144_s23 = int_to_ptr.hbm [resolvable:$true] %s3143_s23 }
 0x103   : > { %v741_v27 = vpop.f32.mrf.mxu1  ;;  %v653_v36 = vadd.f32 %v652_v26, %v3530_v12  ;;  %v2970_v26 = vld [vmem:[#allocation5 + $0x18] sm:$0xff]  ;;  %s3145_s24 = scalar_lea.hbm %s3144_s23, 2  ;;  %p3150_p5 = scmp.lt.s32.totalorder %s3144_s23, %s4347_s8 }
 0x104   : > { %v742_v37 = vadd.f32 %v741_v27, %v3532_v13  ;;  %1683 = vmatpush.bf16.msrb.mxu2 %v2970_v26  ;;  %p3146_p1 = scmp.ne.s32.totalorder %s3144_s23, %s3145_s24  ;;  %p3151_p6 = scmp.lt.s32.totalorder %s3149_s26, %s3145_s24 }
 0x105   : > { %691 = vmatmul.bf16.gmra.mxu0 %v2915_v25  ;;  %v817_v42 = vmax.f32 %v653_v36, 0.0 }
 0x106   : > { %780 = vmatmul.bf16.gmra.mxu1 %v2915_v25  ;;  %v818_v44 = vmax.f32 %v742_v37, 0.0  ;;  %p3147_p2 = pnand %p3146_p1, %p3310_p4  ;;  %p3152_p7 = por %p3151_p6, %p3150_p5 }
 0x108   : > { %p3148_p3 = pneg %p3147_p2 }
 0x10a   : > { %v654_v38 = vpop.f32.mrf.mxu0  ;;  %p3153_p9 = pnand %p3152_p7, %p3148_p3 }
 0x10b   : > { %v655_v39 = vadd.f32 %v654_v38, %v3530_v12  ;;  %v743_v40 = vpop.f32.mrf.mxu1 }
 0x10c   : > { %v744_v41 = vadd.f32 %v743_v40, %v3532_v13 }
 0x10d   : > { %v819_v43 = vmax.f32 %v655_v39, 0.0 }
 0x10e   : > { %v820_v45 = vmax.f32 %v744_v41, 0.0 }
 0x10f   : > { %v3618_v46 = vpack.c.bf16 %v819_v43, %v817_v42 }
 0x110   : > { %v3620_v49 = vpack.c.bf16 %v820_v45, %v818_v44 }
 0x111   : > { %1123 = vmatmul.bf16.gmra.mxu2 %v3618_v46 }
 0x112   : > { %1212 = vmatmul.bf16.gmra.mxu3 %v3620_v49  ;;  %v657_v51 = vpop.f32.mrf.mxu0 }
 0x113   : > { %v746_v53 = vpop.f32.mrf.mxu1  ;;  %v658_v55 = vadd.f32 %v657_v51, %v3530_v12 }
 0x114   : > { %v747_v56 = vadd.f32 %v746_v53, %v3532_v13 }
 0x115   : > { %696 = vmatmul.bf16.gmra.mxu0 %v2916_v50  ;;  %v821_v61 = vmax.f32 %v658_v55, 0.0 }
 0x116   : > { %785 = vmatmul.bf16.gmra.mxu1 %v2916_v50  ;;  %v822_v63 = vmax.f32 %v747_v56, 0.0 }
 0x11a   : > { %v659_v57 = vpop.f32.mrf.mxu0 }
 0x11b   : > { %v660_v58 = vadd.f32 %v659_v57, %v3530_v12  ;;  %v748_v59 = vpop.f32.mrf.mxu1 }
 0x11c   : > { %v749_v60 = vadd.f32 %v748_v59, %v3532_v13 }
 0x11d   : > { %v823_v62 = vmax.f32 %v660_v58, 0.0 }
 0x11e   : > { %v824_v0 = vmax.f32 %v749_v60, 0.0 }
 0x11f   : > { %v3629_v1 = vpack.c.bf16 %v823_v62, %v821_v61  ;;  %v2969_v62 = vld [vmem:[#allocation5 + $0x10] sm:$0xff] }
 0x120   : > { %v3631_v2 = vpack.c.bf16 %v824_v0, %v822_v63  ;;  %1684 = vmatpush.bf16.msrb.mxu2 %v2969_v62  ;;  %v3223_v62 = vmov 0  }
 0x121   : > { %1128 = vmatmul.bf16.gmra.mxu2 %v3629_v1  ;;  %3065 = vset.pattern.permute.xlu0 %v3223_v62 }
 0x122   : > { %1217 = vmatmul.bf16.gmra.mxu3 %v3631_v2  ;;  %v662_v6 = vpop.f32.mrf.mxu0  ;;  %3066 = vset.pattern.permute.xlu1 %v3223_v62 }
 0x123   : > { %v751_v7 = vpop.f32.mrf.mxu1  ;;  %v663_v8 = vadd.f32 %v662_v6, %v3530_v12  ;;  %3067 = vset.pattern.permute.xlu2 %v3223_v62 }
 0x124   : > { %v752_v9 = vadd.f32 %v751_v7, %v3532_v13  ;;  %v2977_v7 = vld [vmem:[#allocation5 + $0x50] sm:$0xff] }
 0x125   : > { %701 = vmatmul.bf16.gmra.mxu0 %v2917_v3  ;;  %v825_v16 = vmax.f32 %v663_v8, 0.0  ;;  %1773 = vmatpush.bf16.msrb.mxu3 %v2977_v7 }
 0x126   : > { %790 = vmatmul.bf16.gmra.mxu1 %v2917_v3  ;;  %v826_v18 = vmax.f32 %v752_v9, 0.0 }
 0x12a   : > { %v664_v10 = vpop.f32.mrf.mxu0 }
 0x12b   : > { %v665_v11 = vadd.f32 %v664_v10, %v3530_v12  ;;  %v753_v14 = vpop.f32.mrf.mxu1 }
 0x12c   : > { %v754_v15 = vadd.f32 %v753_v14, %v3532_v13 }
 0x12d   : > { %v827_v17 = vmax.f32 %v665_v11, 0.0 }
 0x12e   : > { %v828_v19 = vmax.f32 %v754_v15, 0.0 }
 0x12f   : > { %v3640_v20 = vpack.c.bf16 %v827_v17, %v825_v16 }
 0x130   : > { %v3642_v21 = vpack.c.bf16 %v828_v19, %v826_v18 }
 0x131   : > { %1133 = vmatmul.bf16.gmra.mxu2 %v3640_v20 }
 0x132   : > { %1222 = vmatmul.bf16.gmra.mxu3 %v3642_v21  ;;  %v667_v25 = vpop.f32.mrf.mxu0 }
 0x133   : > { %v756_v27 = vpop.f32.mrf.mxu1  ;;  %v668_v29 = vadd.f32 %v667_v25, %v3530_v12 }
 0x134   : > { %v757_v32 = vadd.f32 %v756_v27, %v3532_v13 }
 0x135   : > { %706 = vmatmul.bf16.gmra.mxu0 %v2918_v22  ;;  %v829_v37 = vmax.f32 %v668_v29, 0.0 }
 0x136   : > { %795 = vmatmul.bf16.gmra.mxu1 %v2918_v22  ;;  %v830_v39 = vmax.f32 %v757_v32, 0.0 }
 0x13a   : > { %v669_v33 = vpop.f32.mrf.mxu0 }
 0x13b   : > { %v670_v34 = vadd.f32 %v669_v33, %v3530_v12  ;;  %v758_v35 = vpop.f32.mrf.mxu1 }
 0x13c   : > { %v759_v36 = vadd.f32 %v758_v35, %v3532_v13 }
 0x13d   : > { %v831_v38 = vmax.f32 %v670_v34, 0.0 }
 0x13e   : > { %v832_v40 = vmax.f32 %v759_v36, 0.0 }
 0x13f   : > { %v3651_v41 = vpack.c.bf16 %v831_v38, %v829_v37 }
 0x140   : > { %v3653_v42 = vpack.c.bf16 %v832_v40, %v830_v39 }
 0x141   : > { %1138 = vmatmul.bf16.gmra.mxu2 %v3651_v41 }
 0x142   : > { %1227 = vmatmul.bf16.gmra.mxu3 %v3653_v42  ;;  %v672_v43 = vpop.f32.mrf.mxu0 }
 0x143   : > { %v761_v44 = vpop.f32.mrf.mxu1  ;;  %v673_v45 = vadd.f32 %v672_v43, %v3530_v12 }
 0x144   : > { %v762_v50 = vadd.f32 %v761_v44, %v3532_v13 }
 0x145   : > { %1281 = vmatmul.bf16.vlgmr.msrb.gmra.mxu0 %v3550_v30  ;;  %v833_v55 = vmax.f32 %v673_v45, 0.0  ;;  %v3666_v30 = vld [vmem:[%s4344_s5] sm:$0x3] }
 0x146   : > { %1370 = vmatmul.bf16.vlgmr.msrb.gmra.mxu1 %v3552_v31  ;;  %v834_v57 = vmax.f32 %v762_v50, 0.0  ;;  %v3674_v60 = vperm.slane %v3666_v30, 0 }
 0x14a   : > { %v674_v51 = vpop.f32.mrf.mxu0 }
 0x14b   : > { %v675_v52 = vadd.f32 %v674_v51, %v3530_v12  ;;  %v763_v53 = vpop.f32.mrf.mxu1 }
 0x14c   : > { %v764_v54 = vadd.f32 %v763_v53, %v3532_v13 }
 0x14d   : > { %v835_v56 = vmax.f32 %v675_v52, 0.0 }
 0x14e   : > { %v836_v58 = vmax.f32 %v764_v54, 0.0 }
 0x14f   : > { %v3668_v31 = vpack.c.bf16 %v835_v56, %v833_v55  ;;  %v3708_v55 = vld [vmem:[%s3702_s25] sm:$0xff] }
 0x150   : > { %v3670_v59 = vpack.c.bf16 %v836_v58, %v834_v57  ;;  %vm1921_vm0 = vcmp.eq.s32.totalorder %v3708_v55, 0 }
 0x151   : > { %1143 = vmatmul.bf16.gmra.mxu2 %v3668_v31 }
 0x152   : > { %1232 = vmatmul.bf16.gmra.mxu3 %v3670_v59  ;;  %v677_v61 = vpop.f32.mrf.mxu0 }
 0x153   : > { %v766_v63 = vpop.f32.mrf.mxu1  ;;  %v678_v9 = vadd.f32 %v677_v61, %v3530_v12 }
 0x154   : > { %v1104_v0 = vpop.f32.mrf.mxu2  ;;  %v767_v10 = vadd.f32 %v766_v63, %v3532_v13  ;;  %v1953_v63 = vsel %vm1921_vm0, 1, %v3223_v62 }
 0x155   : > { %v1105_v3 = vadd.f32 %v1104_v0, %v3674_v60  ;;  %v1193_v6 = vpop.f32.mrf.mxu3  ;;  %1286 = vmatmul.bf16.gmra.mxu0 %v3561_v47  ;;  %v837_v18 = vmax.f32 %v678_v9, 0.0  ;;  %1986 = vperm.xlu0 %3065, %v1953_v63  }
 0x156   : > { %1375 = vmatmul.bf16.gmra.mxu1 %v3563_v48  ;;  %v838_v48 = vmax.f32 %v767_v10, 0.0 }
 0x157   : > { %v1194_v8 = vadd.f32 %v1193_v6, %v1105_v3 }
 0x159   : > { %v1451_v29 = vmax.f32 %v1194_v8, 0.0  ;;  %v2968_v8 = vld [vmem:[#allocation5 + $0x8] sm:$0xff] }
 0x15a   : > { %v679_v11 = vpop.f32.mrf.mxu0  ;;  %1685 = vmatpush.bf16.msrb.mxu2 %v2968_v8 }
 0x15b   : > { %v680_v14 = vadd.f32 %v679_v11, %v3530_v12  ;;  %v768_v15 = vpop.f32.mrf.mxu1 }
 0x15c   : > { %v769_v16 = vadd.f32 %v768_v15, %v3532_v13  ;;  %v1106_v17 = vpop.f32.mrf.mxu2 }
 0x15d   : > { %v839_v19 = vmax.f32 %v680_v14, 0.0  ;;  %v1107_v47 = vadd.f32 %v1106_v17, %v3674_v60  ;;  %v1195_v22 = vpop.f32.mrf.mxu3  ;;  %v2976_v17 = vld [vmem:[#allocation5 + $0x48] sm:$0xff] }
 0x15e   : > { %v840_v25 = vmax.f32 %v769_v16, 0.0  ;;  %v3726_v16 = vld [vmem:[%s3702_s25 + $0x8] sm:$0xff]  ;;  %1774 = vmatpush.bf16.msrb.mxu3 %v2976_v17 }
 0x15f   : > { %v1196_v26 = vadd.f32 %v1195_v22, %v1107_v47  ;;  %v3685_v27 = vpack.c.bf16 %v839_v19, %v837_v18  ;;  %vm1922_vm1 = vcmp.eq.s32.totalorder %v3726_v16, 0  ;;  %v3733_v22 = vld [vmem:[%s3702_s25 + $0x10] sm:$0xff] }
 0x160   : > { %v3687_v28 = vpack.c.bf16 %v840_v25, %v838_v48  ;;  %v1954_v19 = vsel %vm1922_vm1, 1, %v3223_v62  ;;  %vm1923_vm2 = vcmp.eq.s32.totalorder %v3733_v22, 0 }
 0x161   : > { %v1453_v32 = vmax.f32 %v1196_v26, 0.0  ;;  %1148 = vmatmul.bf16.gmra.mxu2 %v3685_v27  ;;  %1989 = vperm.xlu0 %3065, %v1954_v19   ;;  %v1955_v26 = vsel %vm1923_vm2, 1, %v3223_v62 }
 0x162   : > { %1237 = vmatmul.bf16.gmra.mxu3 %v3687_v28  ;;  %v682_v33 = vpop.f32.mrf.mxu0  ;;  %1992 = vperm.xlu1 %3066, %v1955_v26  }
 0x163   : > { %v3691_v34 = vpack.c.bf16 %v1453_v32, %v1451_v29  ;;  %v771_v35 = vpop.f32.mrf.mxu1  ;;  %v683_v40 = vadd.f32 %v682_v33, %v3530_v12 }
 0x164   : > { %v1109_v36 = vpop.f32.mrf.mxu2  ;;  %v772_v43 = vadd.f32 %v771_v35, %v3532_v13 }
 0x165   : > { %v1110_v37 = vadd.f32 %v1109_v36, %v3674_v60  ;;  %v1198_v38 = vpop.f32.mrf.mxu3  ;;  %1291 = vmatmul.bf16.gmra.mxu0 %v3584_v4 }
 0x166   : > { %1380 = vmatmul.bf16.gmra.mxu1 %v3586_v5  ;;  %v841_v5 = vmax.f32 %v683_v40, 0.0  ;;  %v842_v56 = vmax.f32 %v772_v43, 0.0 }
 0x167   : > { %v1199_v39 = vadd.f32 %v1198_v38, %v1110_v37  ;;  %v3742_v38 = vld [vmem:[%s3702_s25 + $0x30] sm:$0xff] }
 0x168   : > { %vm1927_vm3 = vcmp.eq.s32.totalorder %v3742_v38, 0 }
 0x169   : > { %v1455_v3 = vmax.f32 %v1199_v39, 0.0 }
 0x16a   : > { %v684_v44 = vpop.f32.mrf.mxu0 }
 0x16b   : > { %v685_v45 = vadd.f32 %v684_v44, %v3530_v12  ;;  %v773_v50 = vpop.f32.mrf.mxu1 }
 0x16c   : > { %v774_v4 = vadd.f32 %v773_v50, %v3532_v13  ;;  %v1111_v51 = vpop.f32.mrf.mxu2 }
 0x16d   : > { %v843_v52 = vmax.f32 %v685_v45, 0.0  ;;  %v1112_v53 = vadd.f32 %v1111_v51, %v3674_v60  ;;  %v1200_v54 = vpop.f32.mrf.mxu3  ;;  %v1959_v45 = vsel %vm1927_vm3, 1, %v3223_v62 }
 0x16e   : > { %v844_v57 = vmax.f32 %v774_v4, 0.0  ;;  %2004 = vperm.xlu0 %3065, %v1959_v45  }
 0x16f   : > { %v1201_v58 = vadd.f32 %v1200_v54, %v1112_v53  ;;  %v3711_v61 = vpack.c.bf16 %v843_v52, %v841_v5  ;;  %v3752_v5 = vld [vmem:[%s3702_s25 + $0x18] sm:$0xff] }
 0x170   : > { %v3716_v0 = vpack.c.bf16 %v844_v57, %v842_v56  ;;  %vm1924_vm4 = vcmp.eq.s32.totalorder %v3752_v5, 0 }
 0x171   : > { %v1457_v6 = vmax.f32 %v1201_v58, 0.0  ;;  %1153 = vmatmul.bf16.gmra.mxu2 %v3711_v61  ;;  %v1956_v54 = vsel %vm1924_vm4, 1, %v3223_v62 }
 0x172   : > { %1242 = vmatmul.bf16.gmra.mxu3 %v3716_v0  ;;  %v687_v7 = vpop.f32.mrf.mxu0  ;;  %1995 = vperm.xlu1 %3066, %v1956_v54  }
 0x173   : > { %v776_v9 = vpop.f32.mrf.mxu1  ;;  %v3721_v10 = vpack.c.bf16 %v1457_v6, %v1455_v3  ;;  %v688_v47 = vadd.f32 %v687_v7, %v3530_v12  ;;  %v3762_v3 = vld [vmem:[%s3702_s25 + $0x48] sm:$0xff] }
 0x174   : > { %v1114_v11 = vpop.f32.mrf.mxu2  ;;  %v777_v48 = vadd.f32 %v776_v9, %v3532_v13  ;;  %vm1930_vm5 = vcmp.eq.s32.totalorder %v3762_v3, 0  ;;  %v3769_v9 = vld [vmem:[%s3702_s25 + $0x38] sm:$0xff] }
 0x175   : > { %v1115_v14 = vadd.f32 %v1114_v11, %v3674_v60  ;;  %v1203_v15 = vpop.f32.mrf.mxu3  ;;  %1296 = vmatmul.bf16.gmra.mxu0 %v3595_v23  ;;  %v845_v33 = vmax.f32 %v688_v47, 0.0  ;;  %v1962_v7 = vsel %vm1930_vm5, 1, %v3223_v62  ;;  %vm1928_vm6 = vcmp.eq.s32.totalorder %v3769_v9, 0 }
 0x176   : > { %1385 = vmatmul.bf16.gmra.mxu1 %v3597_v24  ;;  %v846_v39 = vmax.f32 %v777_v48, 0.0  ;;  %2013 = vperm.xlu0 %3065, %v1962_v7   ;;  %v2975_v7 = vld [vmem:[#allocation5 + $0x40] sm:$0xff] }
 0x177   : > { %v1204_v18 = vadd.f32 %v1203_v15, %v1115_v14  ;;  %v1960_v15 = vsel %vm1928_vm6, 1, %v3223_v62  ;;  %1775 = vmatpush.bf16.msrb.mxu3 %v2975_v7 }
 0x179   : > { %v1459_v4 = vmax.f32 %v1204_v18, 0.0 }
 0x17a   : > { %v689_v23 = vpop.f32.mrf.mxu0  ;;  %2007 = vperm.xlu1 %3066, %v1960_v15  }
 0x17b   : > { %v690_v24 = vadd.f32 %v689_v23, %v3530_v12  ;;  %v778_v25 = vpop.f32.mrf.mxu1 }
 0x17c   : > { %v779_v29 = vadd.f32 %v778_v25, %v3532_v13  ;;  %v1116_v32 = vpop.f32.mrf.mxu2  ;;  %v3781_v25 = vld [vmem:[%s3702_s25 + $0x60] sm:$0xff] }
 0x17d   : > { %v847_v35 = vmax.f32 %v690_v24, 0.0  ;;  %v1117_v36 = vadd.f32 %v1116_v32, %v3674_v60  ;;  %v1205_v37 = vpop.f32.mrf.mxu3  ;;  %v3778_v24 = vld [vmem:[%s3702_s25 + $0x20] sm:$0xff]  ;;  %vm1933_vm8 = vcmp.eq.s32.totalorder %v3781_v25, 0 }
 0x17e   : > { %v848_v40 = vmax.f32 %v779_v29, 0.0  ;;  %vm1925_vm7 = vcmp.eq.s32.totalorder %v3778_v24, 0 }
 0x17f   : > { %v1206_v43 = vadd.f32 %v1205_v37, %v1117_v36  ;;  %v3745_v44 = vpack.c.bf16 %v847_v35, %v845_v33  ;;  %v1957_v35 = vsel %vm1925_vm7, 1, %v3223_v62  ;;  %v1965_v36 = vsel %vm1933_vm8, 1, %v3223_v62 }
 0x180   : > { %v3748_v50 = vpack.c.bf16 %v848_v40, %v846_v39  ;;  %1998 = vperm.xlu2 %3067, %v1957_v35   ;;  %2022 = vperm.xlu0 %3065, %v1965_v36   ;;  %v3827_v35 = vld [vmem:[%s3702_s25 + $0x90] sm:$0xff] }
 0x181   : > { %v1461_v51 = vmax.f32 %v1206_v43, 0.0  ;;  %1158 = vmatmul.bf16.gmra.mxu2 %v3745_v44  ;;  %v3793_v43 = vld [vmem:[%s3702_s25 + $0x50] sm:$0xff]  ;;  %vm1939_vm14 = vcmp.eq.s32.totalorder %v3827_v35, 0 }
 0x182   : > { %1247 = vmatmul.bf16.gmra.mxu3 %v3748_v50  ;;  %v692_v52 = vpop.f32.mrf.mxu0  ;;  %vm1931_vm9 = vcmp.eq.s32.totalorder %v3793_v43, 0 }
 0x183   : > { %v781_v53 = vpop.f32.mrf.mxu1  ;;  %v3757_v56 = vpack.c.bf16 %v1461_v51, %v1459_v4  ;;  %v693_v8 = vadd.f32 %v692_v52, %v3530_v12  ;;  %v2967_v4 = vld [vmem:[#allocation5] sm:$0xff]  ;;  %v1963_v52 = vsel %vm1931_vm9, 1, %v3223_v62 }
 0x184   : > { %v1119_v57 = vpop.f32.mrf.mxu2  ;;  %v782_v11 = vadd.f32 %v781_v53, %v3532_v13  ;;  %1686 = vmatpush.bf16.msrb.mxu2 %v2967_v4  ;;  %2016 = vperm.xlu1 %3066, %v1963_v52  }
 0x185   : > { %v1120_v58 = vadd.f32 %v1119_v57, %v3674_v60  ;;  %v1208_v63 = vpop.f32.mrf.mxu3  ;;  %1301 = vmatmul.bf16.gmra.mxu0 %v3618_v46  ;;  %v849_v19 = vmax.f32 %v693_v8, 0.0 }
 0x186   : > { %1390 = vmatmul.bf16.gmra.mxu1 %v3620_v49  ;;  %v850_v26 = vmax.f32 %v782_v11, 0.0 }
 0x187   : > { %v1209_v6 = vadd.f32 %v1208_v63, %v1120_v58  ;;  %v3803_v63 = vld [vmem:[%s3702_s25 + $0x28] sm:$0xff] }
 0x188   : > { %vm1926_vm10 = vcmp.eq.s32.totalorder %v3803_v63, 0 }
 0x189   : > { %v1463_v39 = vmax.f32 %v1209_v6, 0.0  ;;  %v3806_v6 = vld [vmem:[%s3702_s25 + $0x78] sm:$0xff]  ;;  %v1958_v11 = vsel %vm1926_vm10, 1, %v3223_v62 }
 0x18a   : > { %v694_v14 = vpop.f32.mrf.mxu0  ;;  %vm1936_vm11 = vcmp.eq.s32.totalorder %v3806_v6, 0  ;;  %2001 = vperm.xlu2 %3067, %v1958_v11  }
 0x18b   : > { %v695_v46 = vadd.f32 %v694_v14, %v3530_v12  ;;  %v783_v49 = vpop.f32.mrf.mxu1  ;;  %v1968_v14 = vsel %vm1936_vm11, 1, %v3223_v62 }
 0x18c   : > { %v784_v17 = vadd.f32 %v783_v49, %v3532_v13  ;;  %v1121_v18 = vpop.f32.mrf.mxu2  ;;  %2031 = vperm.xlu0 %3065, %v1968_v14  }
 0x18d   : > { %v851_v47 = vmax.f32 %v695_v46, 0.0  ;;  %v1122_v48 = vadd.f32 %v1121_v18, %v3674_v60  ;;  %v1210_v23 = vpop.f32.mrf.mxu3  ;;  %v3815_v46 = vld [vmem:[%s3702_s25 + $0x68] sm:$0xff] }
 0x18e   : > { %v852_v29 = vmax.f32 %v784_v17, 0.0  ;;  %vm1934_vm12 = vcmp.eq.s32.totalorder %v3815_v46, 0 }
 0x18f   : > { %v1211_v32 = vadd.f32 %v1210_v23, %v1122_v48  ;;  %v3785_v33 = vpack.c.bf16 %v851_v47, %v849_v19  ;;  %v1966_v18 = vsel %vm1934_vm12, 1, %v3223_v62 }
 0x190   : > { %v3789_v37 = vpack.c.bf16 %v852_v29, %v850_v26  ;;  %2025 = vperm.xlu1 %3066, %v1966_v18  }
 0x191   : > { %v1465_v40 = vmax.f32 %v1211_v32, 0.0  ;;  %1163 = vmatmul.bf16.gmra.mxu2 %v3785_v33  ;;  %v3824_v32 = vld [vmem:[%s3702_s25 + $0x40] sm:$0xff] }
 0x192   : > { %1252 = vmatmul.bf16.gmra.mxu3 %v3789_v37  ;;  %v697_v45 = vpop.f32.mrf.mxu0  ;;  %vm1929_vm13 = vcmp.eq.s32.totalorder %v3824_v32, 0 }
 0x193   : > { %v786_v51 = vpop.f32.mrf.mxu1  ;;  %v3798_v53 = vpack.c.bf16 %v1465_v40, %v1463_v39  ;;  %v1961_v4 = vsel %vm1929_vm13, 1, %v3223_v62  ;;  %vm2183_vm13 = vcmp.eq.s32.totalorder %v3726_v16, 1 }
 0x194   : > { %v1124_v54 = vpop.f32.mrf.mxu2  ;;  %2010 = vperm.xlu2 %3067, %v1961_v4  }
 0x195   : > { %v1125_v57 = vadd.f32 %v1124_v54, %v3674_v60  ;;  %v1213_v58 = vpop.f32.mrf.mxu3  ;;  %1306 = vmatmul.bf16.gmra.mxu0 %v3629_v1  ;;  %v698_v1 = vadd.f32 %v697_v45, %v3530_v12 }
 0x196   : > { %1395 = vmatmul.bf16.gmra.mxu1 %v3631_v2  ;;  %v787_v2 = vadd.f32 %v786_v51, %v3532_v13  ;;  %v1971_v51 = vsel %vm1939_vm14, 1, %v3223_v62 }
 0x197   : > { %v1214_v8 = vadd.f32 %v1213_v58, %v1125_v57  ;;  %v853_v48 = vmax.f32 %v698_v1, 0.0  ;;  %2040 = vperm.xlu0 %3065, %v1971_v51   ;;  %v3839_v58 = vld [vmem:[%s3702_s25 + $0x80] sm:$0xff] }
 0x198   : > { %v854_v36 = vmax.f32 %v787_v2, 0.0  ;;  %vm1937_vm15 = vcmp.eq.s32.totalorder %v3839_v58, 0 }
 0x199   : > { %v1467_v54 = vmax.f32 %v1214_v8, 0.0  ;;  %v1969_v14 = vsel %vm1937_vm15, 1, %v3223_v62 }
 0x19a   : > { %v699_v49 = vpop.f32.mrf.mxu0  ;;  %2034 = vperm.xlu1 %3066, %v1969_v14  }
 0x19b   : > { %v700_v15 = vadd.f32 %v699_v49, %v3530_v12  ;;  %v788_v17 = vpop.f32.mrf.mxu1 }
 0x19c   : > { %v789_v19 = vadd.f32 %v788_v17, %v3532_v13  ;;  %v1126_v47 = vpop.f32.mrf.mxu2  ;;  %v3852_v17 = vld [vmem:[%s3702_s25 + $0xa8] sm:$0xff] }
 0x19d   : > { %v855_v23 = vmax.f32 %v700_v15, 0.0  ;;  %v1127_v26 = vadd.f32 %v1126_v47, %v3674_v60  ;;  %v1215_v29 = vpop.f32.mrf.mxu3  ;;  %v3849_v15 = vld [vmem:[%s3702_s25 + $0x58] sm:$0xff]  ;;  %vm1942_vm1 = vcmp.eq.s32.totalorder %v3852_v17, 0 }
 0x19e   : > { %v856_v39 = vmax.f32 %v789_v19, 0.0  ;;  %vm1932_vm0 = vcmp.eq.s32.totalorder %v3849_v15, 0  ;;  %v1974_v47 = vsel %vm1942_vm1, 1, %v3223_v62  ;;  %vm2184_vm1 = vcmp.eq.s32.totalorder %v3733_v22, 1 }
 0x19f   : > { %v1216_v40 = vadd.f32 %v1215_v29, %v1127_v26  ;;  %v3831_v45 = vpack.c.bf16 %v855_v23, %v853_v48  ;;  %v1964_v19 = vsel %vm1932_vm0, 1, %v3223_v62  ;;  %2049 = vperm.xlu0 %3065, %v1974_v47   ;;  %vm2186_vm0 = vcmp.eq.s32.totalorder %v3778_v24, 1 }
 0x1a0   : > { %v3835_v52 = vpack.c.bf16 %v856_v39, %v854_v36  ;;  %2019 = vperm.xlu2 %3067, %v1964_v19   ;;  %v2216_v24 = vsel %vm2184_vm1, 1, %v3223_v62 }
 0x1a1   : > { %v1469_v57 = vmax.f32 %v1216_v40, 0.0  ;;  %1168 = vmatmul.bf16.gmra.mxu2 %v3831_v45 }
 0x1a2   : > { %1257 = vmatmul.bf16.gmra.mxu3 %v3835_v52  ;;  %v702_v7 = vpop.f32.mrf.mxu0 }
 0x1a3   : > { %v791_v11 = vpop.f32.mrf.mxu1  ;;  %v3844_v1 = vpack.c.bf16 %v1469_v57, %v1467_v54  ;;  %v703_v48 = vadd.f32 %v702_v7, %v3530_v12  ;;  %v3870_v7 = vld [vmem:[%s3702_s25 + $0x70] sm:$0xff] }
 0x1a4   : > { %v1129_v2 = vpop.f32.mrf.mxu2  ;;  %v792_v23 = vadd.f32 %v791_v11, %v3532_v13  ;;  %v3873_v11 = vld [vmem:[%s3702_s25 + $0xc0] sm:$0xff]  ;;  %vm1935_vm3 = vcmp.eq.s32.totalorder %v3870_v7, 0 }
 0x1a5   : > { %v1130_v8 = vadd.f32 %v1129_v2, %v3674_v60  ;;  %v1218_v49 = vpop.f32.mrf.mxu3  ;;  %1311 = vmatmul.bf16.gmra.mxu0 %v3640_v20  ;;  %v3861_v20 = vld [vmem:[%s3702_s25 + $0x98] sm:$0xff]  ;;  %v857_v4 = vmax.f32 %v703_v48, 0.0  ;;  %vm1945_vm4 = vcmp.eq.s32.totalorder %v3873_v11, 0  ;;  %v1967_v19 = vsel %vm1935_vm3, 1, %v3223_v62 }
 0x1a6   : > { %1400 = vmatmul.bf16.gmra.mxu1 %v3642_v21  ;;  %vm1940_vm2 = vcmp.eq.s32.totalorder %v3861_v20, 0  ;;  %v858_v14 = vmax.f32 %v792_v23, 0.0  ;;  %v1977_v47 = vsel %vm1945_vm4, 1, %v3223_v62  ;;  %v3885_v23 = vld [vmem:[%s3702_s25 + $0xb0] sm:$0xff]  ;;  %vm2189_vm3 = vcmp.eq.s32.totalorder %v3769_v9, 1 }
 0x1a7   : > { %v1219_v18 = vadd.f32 %v1218_v49, %v1130_v8  ;;  %v1972_v36 = vsel %vm1940_vm2, 1, %v3223_v62  ;;  %2058 = vperm.xlu0 %3065, %v1977_v47   ;;  %vm1943_vm5 = vcmp.eq.s32.totalorder %v3885_v23, 0  ;;  %vm2187_vm4 = vcmp.eq.s32.totalorder %v3803_v63, 1 }
 0x1a8   : > { %2043 = vperm.xlu1 %3066, %v1972_v36   ;;  %2028 = vperm.xlu2 %3067, %v1967_v19   ;;  %vm2204_vm1 = vcmp.eq.s32.totalorder %v3885_v23, 1 }
 0x1aa   : > { %v704_v21 = vpop.f32.mrf.mxu0 }
 0x1ab   : > { %v705_v26 = vadd.f32 %v704_v21, %v3530_v12  ;;  %v793_v29 = vpop.f32.mrf.mxu1  ;;  %v1471_v21 = vmax.f32 %v1219_v18, 0.0 }
 0x1ac   : > { %v794_v39 = vadd.f32 %v793_v29, %v3532_v13  ;;  %v1131_v40 = vpop.f32.mrf.mxu2 }
 0x1ad   : > { %v859_v51 = vmax.f32 %v705_v26, 0.0  ;;  %v1132_v54 = vadd.f32 %v1131_v40, %v3674_v60  ;;  %v1220_v57 = vpop.f32.mrf.mxu3 }
 0x1ae   : > { %v860_v2 = vmax.f32 %v794_v39, 0.0  ;;  %v1975_v39 = vsel %vm1943_vm5, 1, %v3223_v62  ;;  %vm2182_vm5 = vcmp.eq.s32.totalorder %v3708_v55, 1 }
 0x1af   : > { %v1221_v8 = vadd.f32 %v1220_v57, %v1132_v54  ;;  %v3877_v49 = vpack.c.bf16 %v859_v51, %v857_v4  ;;  %v3895_v54 = vld [vmem:[%s3702_s25 + $0x88] sm:$0xff]  ;;  %v3898_v57 = vld [vmem:[%s3702_s25 + $0xd8] sm:$0xff]  ;;  %v2214_v63 = vsel %vm2182_vm5, 1, %v3223_v62 }
 0x1b0   : > { %v3881_v48 = vpack.c.bf16 %v860_v2, %v858_v14  ;;  %2052 = vperm.xlu1 %3066, %v1975_v39   ;;  %4363 = vst [vmem:[#allocation14_spill] sm:$0xff] %v3898_v57  ;;  %vm1938_vm6 = vcmp.eq.s32.totalorder %v3895_v54, 0  ;;  %vm1948_vm7 = vcmp.eq.s32.totalorder %v3898_v57, 0  ;;  %v3916_v57 = vld [vmem:[%s3702_s25 + $0xa0] sm:$0xff] }
 0x1b1   : > { %4361 = vst [vmem:[#allocation12_spill] sm:$0xff] %v3877_v49  ;;  %v1473_v26 = vmax.f32 %v1221_v8, 0.0  ;;  %1173 = vmatmul.bf16.gmra.mxu2 %v3877_v49  ;;  %v1970_v2 = vsel %vm1938_vm6, 1, %v3223_v62  ;;  %v1980_v8 = vsel %vm1948_vm7, 1, %v3223_v62  ;;  %vm1941_vm9 = vcmp.eq.s32.totalorder %v3916_v57, 0 }
 0x1b2   : > { %4362 = vst [vmem:[#allocation13_spill] sm:$0xff] %v3881_v48  ;;  %1262 = vmatmul.bf16.gmra.mxu3 %v3881_v48  ;;  %v707_v29 = vpop.f32.mrf.mxu0  ;;  %2037 = vperm.xlu2 %3067, %v1970_v2   ;;  %vm2192_vm6 = vcmp.eq.s32.totalorder %v3793_v43, 1  ;;  %vm2190_vm7 = vcmp.eq.s32.totalorder %v3824_v32, 1 }
 0x1b3   : > { %v796_v36 = vpop.f32.mrf.mxu1  ;;  %v3890_v40 = vpack.c.bf16 %v1473_v26, %v1471_v21  ;;  %v708_v19 = vadd.f32 %v707_v29, %v3530_v12  ;;  %2067 = vperm.xlu0 %3065, %v1980_v8   ;;  %v2222_v55 = vsel %vm2190_vm7, 1, %v3223_v62 }
 0x1b4   : > { %v1134_v4 = vpop.f32.mrf.mxu2  ;;  %v797_v47 = vadd.f32 %v796_v36, %v3532_v13  ;;  %v3919_v36 = vld [vmem:[%s3702_s25 + $0xf0] sm:$0xff] }
 0x1b5   : > { %v1135_v18 = vadd.f32 %v1134_v4, %v3674_v60  ;;  %v1223_v51 = vpop.f32.mrf.mxu3  ;;  %1316 = vmatmul.bf16.gmra.mxu0 %v3651_v41  ;;  %v3907_v41 = vld [vmem:[%s3702_s25 + $0xc8] sm:$0xff]  ;;  %v861_v29 = vmax.f32 %v708_v19, 0.0  ;;  %vm1951_vm10 = vcmp.eq.s32.totalorder %v3919_v36, 0  ;;  %v1973_v19 = vsel %vm1941_vm9, 1, %v3223_v62 }
 0x1b6   : > { %1405 = vmatmul.bf16.gmra.mxu1 %v3653_v42  ;;  %vm1946_vm8 = vcmp.eq.s32.totalorder %v3907_v41, 0  ;;  %v862_v48 = vmax.f32 %v797_v47, 0.0  ;;  %v3931_v47 = vld [vmem:[%s3702_s25 + $0xe0] sm:$0xff]  ;;  %vm2193_vm9 = vcmp.eq.s32.totalorder %v3849_v15, 1 }
 0x1b7   : > { %v1224_v14 = vadd.f32 %v1223_v51, %v1135_v18  ;;  %v1978_v39 = vsel %vm1946_vm8, 1, %v3223_v62  ;;  %vm1949_vm11 = vcmp.eq.s32.totalorder %v3931_v47, 0  ;;  %vm2195_vm8 = vcmp.eq.s32.totalorder %v3815_v46, 1 }
 0x1b8   : > { %2061 = vperm.xlu1 %3066, %v1978_v39   ;;  %vm2210_vm7 = vcmp.eq.s32.totalorder %v3931_v47, 1 }
 0x1ba   : > { %v709_v42 = vpop.f32.mrf.mxu0  ;;  %2046 = vperm.xlu2 %3067, %v1973_v19  }
 0x1bb   : > { %v710_v21 = vadd.f32 %v709_v42, %v3530_v12  ;;  %v798_v26 = vpop.f32.mrf.mxu1  ;;  %v1983_v42 = vsel %vm1951_vm10, 1, %v3223_v62  ;;  %vm2185_vm10 = vcmp.eq.s32.totalorder %v3752_v5, 1 }
 0x1bc   : > { %v799_v4 = vadd.f32 %v798_v26, %v3532_v13  ;;  %v1136_v18 = vpop.f32.mrf.mxu2  ;;  %v1475_v26 = vmax.f32 %v1224_v14, 0.0  ;;  %2076 = vperm.xlu0 %3065, %v1983_v42   ;;  %v2215_v42 = vsel %vm2183_vm13, 1, %v3223_v62  ;;  %vm2188_vm13 = vcmp.eq.s32.totalorder %v3742_v38, 1 }
 0x1bd   : > { %v863_v51 = vmax.f32 %v710_v21, 0.0  ;;  %v1137_v2 = vadd.f32 %v1136_v18, %v3674_v60  ;;  %v1225_v8 = vpop.f32.mrf.mxu3 }
 0x1be   : > { %v864_v49 = vmax.f32 %v799_v4, 0.0  ;;  %v3935_v4 = vperm.slane %v3666_v30, 1 }
 0x1bf   : > { %v1226_v12 = vadd.f32 %v1225_v8, %v1137_v2  ;;  %v3923_v13 = vpack.c.bf16 %v863_v51, %v861_v29  ;;  %v3944_v8 = vld [vmem:[%s3702_s25 + $0xb8] sm:$0xff] }
 0x1c0   : > { %v3927_v21 = vpack.c.bf16 %v864_v49, %v862_v48  ;;  %v1981_v49 = vsel %vm1949_vm11, 1, %v3223_v62  ;;  %vm1944_vm12 = vcmp.eq.s32.totalorder %v3944_v8, 0  ;;  %vm2198_vm11 = vcmp.eq.s32.totalorder %v3839_v58, 1 }
 0x1c1   : > { %4364 = vst [vmem:[#allocation15_spill] sm:$0xff] %v3923_v13  ;;  %v1477_v39 = vmax.f32 %v1226_v12, 0.0  ;;  %1178 = vmatmul.bf16.gmra.mxu2 %v3923_v13  ;;  %2070 = vperm.xlu1 %3066, %v1981_v49   ;;  %v1976_v19 = vsel %vm1944_vm12, 1, %v3223_v62  ;;  %vm2196_vm12 = vcmp.eq.s32.totalorder %v3870_v7, 1  ;;  %vm2205_vm5 = vcmp.eq.s32.totalorder %v3944_v8, 1 }
 0x1c2   : > { %4365 = vst [vmem:[#allocation16_spill] sm:$0xff] %v3927_v21  ;;  %1267 = vmatmul.bf16.gmra.mxu3 %v3927_v21  ;;  %v1282_v18 = vpop.f32.mrf.mxu0  ;;  %2055 = vperm.xlu2 %3067, %v1976_v19   ;;  %v3960_v21 = vld [vmem:[%s3702_s25 + $0xd0] sm:$0xff]  ;;  %v2228_v58 = vsel %vm2196_vm12, 1, %v3223_v62  ;;  %vm2203_vm12 = vcmp.eq.s32.totalorder %v3852_v17, 1 }
 0x1c3   : > { %v1371_v29 = vpop.f32.mrf.mxu1  ;;  %v3939_v48 = vpack.c.bf16 %v1477_v39, %v1475_v26  ;;  %v1283_v30 = vadd.f32 %v1282_v18, %v3935_v4  ;;  %v3953_v26 = vld [vmem:[%s3702_s25 + $0xf8] sm:$0xff]  ;;  %vm1947_vm15 = vcmp.eq.s32.totalorder %v3960_v21, 0 }
 0x1c4   : > { %v1139_v14 = vpop.f32.mrf.mxu2  ;;  %2250 = vperm.xlu0 %3065, %v2215_v42   ;;  %vm1952_vm14 = vcmp.eq.s32.totalorder %v3953_v26, 0  ;;  %v1979_v42 = vsel %vm1947_vm15, 1, %v3223_v62  ;;  %vm2199_vm15 = vcmp.eq.s32.totalorder %v3895_v54, 1 }
 0x1c5   : > { %v1140_v51 = vadd.f32 %v1139_v14, %v3674_v60  ;;  %v1228_v2 = vpop.f32.mrf.mxu3  ;;  %1321 = vmatmul.bf16.gmra.mxu0 %v3668_v31  ;;  %v1372_v31 = vadd.f32 %v1371_v29, %v1283_v30  ;;  %v1984_v49 = vsel %vm1952_vm14, 1, %v3223_v62  ;;  %vm2201_vm14 = vcmp.eq.s32.totalorder %v3861_v20, 1 }
 0x1c6   : > { %1410 = vmatmul.bf16.gmra.mxu1 %v3670_v59  ;;  %v2231_v20 = vsel %vm2199_vm15, 1, %v3223_v62  ;;  %vm2212_vm15 = vcmp.eq.s32.totalorder %v3919_v36, 1 }
 0x1c7   : > { %v1229_v12 = vadd.f32 %v1228_v2, %v1140_v51  ;;  %v1452_v19 = vmax.f32 %v1372_v31, 0.0  ;;  %v4010_v5 = vpop.permute.xlu0 %1986 }
 0x1c9   : > { %2079 = vperm.xlu1 %3066, %v1984_v49   ;;  %v1479_v13 = vmax.f32 %v1229_v12, 0.0 }
 0x1ca   : > { %v1284_v39 = vpop.f32.mrf.mxu0  ;;  %2064 = vperm.xlu2 %3067, %v1979_v42  }
 0x1cb   : > { %v1285_v59 = vadd.f32 %v1284_v39, %v3935_v4  ;;  %v1373_v18 = vpop.f32.mrf.mxu1  ;;  %v2218_v39 = vsel %vm2186_vm0, 1, %v3223_v62  ;;  %vm2191_vm0 = vcmp.eq.s32.totalorder %v3762_v3, 1 }
 0x1cc   : > { %v1141_v16 = vpop.f32.mrf.mxu2  ;;  %2259 = vperm.xlu0 %3065, %v2218_v39  }
 0x1cd   : > { %v1374_v14 = vadd.f32 %v1373_v18, %v1285_v59  ;;  %v1142_v51 = vadd.f32 %v1141_v16, %v3674_v60  ;;  %v1230_v2 = vpop.f32.mrf.mxu3 }
 0x1cf   : > { %v1454_v29 = vmax.f32 %v1374_v14, 0.0  ;;  %v1231_v30 = vadd.f32 %v1230_v2, %v1142_v51  ;;  %v3974_v2 = vld [vmem:[%s3702_s25 + $0xe8] sm:$0xff] }
 0x1d0   : > { %vm1950_vm2 = vcmp.eq.s32.totalorder %v3974_v2, 0 }
 0x1d1   : > { %v1516_v59 = vpack.c.bf16 %v1454_v29, %v1452_v19  ;;  %v1481_v18 = vmax.f32 %v1231_v30, 0.0  ;;  %1687 = vmatmul.bf16.vlgmr.msrb.gmra.mxu2 %v3691_v34  ;;  %2253 = vperm.xlu1 %3066, %v2216_v24   ;;  %v2221_v19 = vsel %vm2189_vm3, 1, %v3223_v62  ;;  %vm2194_vm3 = vcmp.eq.s32.totalorder %v3781_v25, 1 }
 0x1d2   : > { %v1287_v49 = vpop.f32.mrf.mxu0 }
 0x1d3   : > { %v1376_v31 = vpop.f32.mrf.mxu1  ;;  %1776 = vmatmul.bf16.vlgmr.msrb.gmra.mxu3 %v1516_v59  ;;  %v3969_v16 = vpack.c.bf16 %v1481_v18, %v1479_v13  ;;  %v1288_v34 = vadd.f32 %v1287_v49, %v3935_v4  ;;  %v1982_v13 = vsel %vm1950_vm2, 1, %v3223_v62  ;;  %vm2202_vm2 = vcmp.eq.s32.totalorder %v3916_v57, 1 }
 0x1d4   : > { %v1144_v14 = vpop.f32.mrf.mxu2  ;;  %2073 = vperm.xlu2 %3067, %v1982_v13   ;;  %2268 = vperm.xlu0 %3065, %v2221_v19   ;;  %v4026_v38 = vpop.permute.xlu1 %1992  ;;  %v2234_v23 = vsel %vm2202_vm2, 1, %v3223_v62  ;;  %v2226_v57 = vsel %vm2194_vm3, 1, %v3223_v62 }
 0x1d5   : > { %v1145_v51 = vadd.f32 %v1144_v14, %v3674_v60  ;;  %v1233_v12 = vpop.f32.mrf.mxu3  ;;  %1326 = vmatmul.bf16.gmra.mxu0 %v3685_v27  ;;  %v1377_v29 = vadd.f32 %v1376_v31, %v1288_v34  ;;  %v2224_v14 = vsel %vm2192_vm6, 1, %v3223_v62  ;;  %vm2197_vm6 = vcmp.eq.s32.totalorder %v3806_v6, 1 }
 0x1d6   : > { %1415 = vmatmul.bf16.gmra.mxu1 %v3687_v28  ;;  %v2219_v28 = vsel %vm2187_vm4, 1, %v3223_v62  ;;  %vm2207_vm4 = vcmp.eq.s32.totalorder %v3907_v41, 1  ;;  %v2229_v8 = vsel %vm2197_vm6, 1, %v3223_v62 }
 0x1d7   : > { %v1234_v22 = vadd.f32 %v1233_v12, %v1145_v51  ;;  %v1456_v49 = vmax.f32 %v1377_v29, 0.0 }
 0x1d9   : > { %2262 = vperm.xlu1 %3066, %v2219_v28   ;;  %v1483_v51 = vmax.f32 %v1234_v22, 0.0  ;;  %v2227_v22 = vsel %vm2195_vm8, 1, %v3223_v62  ;;  %vm2208_vm8 = vcmp.eq.s32.totalorder %v3960_v21, 1 }
 0x1da   : > { %v1289_v30 = vpop.f32.mrf.mxu0  ;;  %v2240_v47 = vsel %vm2208_vm8, 1, %v3223_v62 }
 0x1db   : > { %v1290_v27 = vadd.f32 %v1289_v30, %v3935_v4  ;;  %v1378_v42 = vpop.f32.mrf.mxu1 }
 0x1dc   : > { %v1146_v39 = vpop.f32.mrf.mxu2  ;;  %2247 = vperm.xlu2 %3067, %v2214_v63   ;;  %2277 = vperm.xlu0 %3065, %v2224_v14   ;;  %v2230_v63 = vsel %vm2198_vm11, 1, %v3223_v62  ;;  %vm2211_vm11 = vcmp.eq.s32.totalorder %v3974_v2, 1 }
 0x1dd   : > { %v1379_v59 = vadd.f32 %v1378_v42, %v1290_v27  ;;  %v1147_v9 = vadd.f32 %v1146_v39, %v3674_v60  ;;  %v1235_v18 = vpop.f32.mrf.mxu3 }
 0x1df   : > { %v1458_v31 = vmax.f32 %v1379_v59, 0.0  ;;  %v1236_v24 = vadd.f32 %v1235_v18, %v1147_v9  ;;  %v2225_v9 = vsel %vm2193_vm9, 1, %v3223_v62  ;;  %vm2200_vm9 = vcmp.eq.s32.totalorder %v3827_v35, 1 }
 0x1e1   : > { %v1485_v12 = vmax.f32 %v1236_v24, 0.0  ;;  %1692 = vmatmul.bf16.gmra.mxu2 %v3721_v10  ;;  %v1518_v34 = vpack.c.bf16 %v1458_v31, %v1456_v49  ;;  %2271 = vperm.xlu1 %3066, %v2222_v55   ;;  %v2217_v49 = vsel %vm2185_vm10, 1, %v3223_v62  ;;  %vm2213_vm10 = vcmp.eq.s32.totalorder %v3953_v26, 1 }
 0x1e2   : > { %v1292_v13 = vpop.f32.mrf.mxu0  ;;  %v2245_v35 = vsel %vm2213_vm10, 1, %v3223_v62 }
 0x1e3   : > { %v1381_v19 = vpop.f32.mrf.mxu1  ;;  %1781 = vmatmul.bf16.gmra.mxu3 %v1518_v34  ;;  %v3993_v43 = vpack.c.bf16 %v1485_v12, %v1483_v51  ;;  %v1293_v10 = vadd.f32 %v1292_v13, %v3935_v4 }
 0x1e4   : > { %v1149_v29 = vpop.f32.mrf.mxu2  ;;  %2286 = vperm.xlu0 %3065, %v2227_v22   ;;  %2256 = vperm.xlu2 %3067, %v2217_v49   ;;  %v2236_v49 = vsel %vm2204_vm1, 1, %v3223_v62 }
 0x1e5   : > { %v1150_v30 = vadd.f32 %v1149_v29, %v3674_v60  ;;  %v1238_v27 = vpop.f32.mrf.mxu3  ;;  %1331 = vmatmul.bf16.gmra.mxu0 %v3711_v61  ;;  %v1382_v28 = vadd.f32 %v1381_v19, %v1293_v10  ;;  %v2233_v10 = vsel %vm2201_vm14, 1, %v3223_v62 }
 0x1e6   : > { %1420 = vmatmul.bf16.gmra.mxu1 %v3716_v0 }
 0x1e7   : > { %v1239_v32 = vadd.f32 %v1238_v27, %v1150_v30  ;;  %v1460_v15 = vmax.f32 %v1382_v28, 0.0  ;;  %v2220_v30 = vsel %vm2188_vm13, 1, %v3223_v62  ;;  %v4030_v28 = vpop.permute.xlu0 %1989  ;;  %vm2206_vm13 = vcmp.eq.s32.totalorder %v3873_v11, 1 }
 0x1e8   : > { %vm2082_vm1 = vcmp.eq.s32.totalorder %v4030_v28, 1 }
 0x1e9   : > { %2280 = vperm.xlu1 %3066, %v2225_v9   ;;  %v1487_v14 = vmax.f32 %v1239_v32, 0.0  ;;  %v4024_v32 = vpop.permute.xlu2 %1998 }
 0x1ea   : > { %v1294_v42 = vpop.f32.mrf.mxu0  ;;  %vm2085_vm8 = vcmp.eq.s32.totalorder %v4024_v32, 1 }
 0x1eb   : > { %v1295_v39 = vadd.f32 %v1294_v42, %v3935_v4  ;;  %v1383_v59 = vpop.f32.mrf.mxu1 }
 0x1ec   : > { %v1151_v61 = vpop.f32.mrf.mxu2  ;;  %2295 = vperm.xlu0 %3065, %v2230_v63   ;;  %2265 = vperm.xlu2 %3067, %v2220_v30  }
 0x1ed   : > { %v1384_v0 = vadd.f32 %v1383_v59, %v1295_v39  ;;  %v1152_v46 = vadd.f32 %v1151_v61, %v3674_v60  ;;  %v1240_v18 = vpop.f32.mrf.mxu3 }
 0x1ef   : > { %v1462_v31 = vmax.f32 %v1384_v0, 0.0  ;;  %v1241_v24 = vadd.f32 %v1240_v18, %v1152_v46  ;;  %v2223_v0 = vsel %vm2191_vm0, 1, %v3223_v62  ;;  %vm2081_vm0 = vcmp.eq.s32.totalorder %v4010_v5, 1 }
 0x1f1   : > { %v1489_v51 = vmax.f32 %v1241_v24, 0.0  ;;  %1697 = vmatmul.bf16.gmra.mxu2 %v3757_v56  ;;  %v1520_v12 = vpack.c.bf16 %v1462_v31, %v1460_v15  ;;  %2289 = vperm.xlu1 %3066, %v2228_v58   ;;  %v4039_v63 = vpop.permute.xlu2 %2001  ;;  %v4050_v58 = vpop.permute.xlu0 %2004 }
 0x1f2   : > { %v1297_v34 = vpop.f32.mrf.mxu0  ;;  %vm2086_vm10 = vcmp.eq.s32.totalorder %v4039_v63, 1 }
 0x1f3   : > { %v1386_v13 = vpop.f32.mrf.mxu1  ;;  %1786 = vmatmul.bf16.gmra.mxu3 %v1520_v12  ;;  %v4014_v19 = vpack.c.bf16 %v1489_v51, %v1487_v14  ;;  %v1298_v7 = vadd.f32 %v1297_v34, %v3935_v4  ;;  %v4042_v51 = vpop.permute.xlu1 %1995 }
 0x1f4   : > { %v1154_v55 = vpop.f32.mrf.mxu2  ;;  %2304 = vperm.xlu0 %3065, %v2233_v10   ;;  %2274 = vperm.xlu2 %3067, %v2223_v0   ;;  %vm2084_vm6 = vcmp.eq.s32.totalorder %v4042_v51, 1 }
 0x1f5   : > { %v1155_v29 = vadd.f32 %v1154_v55, %v3674_v60  ;;  %v1243_v56 = vpop.f32.mrf.mxu3  ;;  %1336 = vmatmul.bf16.gmra.mxu0 %v3745_v44  ;;  %v1387_v44 = vadd.f32 %v1386_v13, %v1298_v7 }
 0x1f6   : > { %1425 = vmatmul.bf16.gmra.mxu1 %v3748_v50 }
 0x1f7   : > { %v1244_v27 = vadd.f32 %v1243_v56, %v1155_v29  ;;  %v1464_v54 = vmax.f32 %v1387_v44, 0.0  ;;  %v2239_v56 = vsel %vm2207_vm4, 1, %v3223_v62  ;;  %vm2083_vm4 = vcmp.eq.s32.totalorder %v4026_v38, 1 }
 0x1f9   : > { %2298 = vperm.xlu1 %3066, %v2231_v20   ;;  %v1491_v15 = vmax.f32 %v1244_v27, 0.0  ;;  %v2237_v27 = vsel %vm2205_vm5, 1, %v3223_v62 }
 0x1fa   : > { %v1299_v22 = vpop.f32.mrf.mxu0 }
 0x1fb   : > { %v1300_v42 = vadd.f32 %v1299_v22, %v3935_v4  ;;  %v1388_v50 = vpop.f32.mrf.mxu1 }
 0x1fc   : > { %v1156_v39 = vpop.f32.mrf.mxu2  ;;  %2313 = vperm.xlu0 %3065, %v2236_v49   ;;  %2283 = vperm.xlu2 %3067, %v2226_v57  }
 0x1fd   : > { %v1389_v59 = vadd.f32 %v1388_v50, %v1300_v42  ;;  %v1157_v9 = vadd.f32 %v1156_v39, %v3674_v60  ;;  %v1245_v61 = vpop.f32.mrf.mxu3  ;;  %v4064_v42 = vpop.permute.xlu1 %2007 }
 0x1ff   : > { %v1466_v46 = vmax.f32 %v1389_v59, 0.0  ;;  %v1246_v18 = vadd.f32 %v1245_v61, %v1157_v9  ;;  %v4068_v59 = vpop.permute.xlu0 %2013  ;;  %v2242_v9 = vsel %vm2210_vm7, 1, %v3223_v62 }
 0x201   : > { %v1493_v31 = vmax.f32 %v1246_v18, 0.0  ;;  %1702 = vmatmul.bf16.gmra.mxu2 %v3798_v53  ;;  %v1522_v24 = vpack.c.bf16 %v1466_v46, %v1464_v54  ;;  %2307 = vperm.xlu1 %3066, %v2234_v23  }
 0x202   : > { %v1302_v3 = vpop.f32.mrf.mxu0 }
 0x203   : > { %v1391_v14 = vpop.f32.mrf.mxu1  ;;  %1791 = vmatmul.bf16.gmra.mxu3 %v1522_v24  ;;  %v4045_v12 = vpack.c.bf16 %v1493_v31, %v1491_v15  ;;  %v1303_v55 = vadd.f32 %v1302_v3, %v3935_v4 }
 0x204   : > { %v1159_v34 = vpop.f32.mrf.mxu2  ;;  %2322 = vperm.xlu0 %3065, %v2239_v56   ;;  %2292 = vperm.xlu2 %3067, %v2229_v8   ;;  %v2235_v56 = vsel %vm2203_vm12, 1, %v3223_v62  ;;  %vm2087_vm12 = vcmp.eq.s32.totalorder %v4050_v58, 1 }
 0x205   : > { %v1160_v53 = vadd.f32 %v1159_v34, %v3674_v60  ;;  %v1248_v13 = vpop.f32.mrf.mxu3  ;;  %1341 = vmatmul.bf16.gmra.mxu0 %v3785_v33  ;;  %v1392_v30 = vadd.f32 %v1391_v14, %v1303_v55  ;;  %v4085_v14 = vpop.permute.xlu1 %2016 }
 0x206   : > { %1430 = vmatmul.bf16.gmra.mxu1 %v3789_v37  ;;  %v4060_v37 = vpop.permute.xlu2 %2010 }
 0x207   : > { %v1249_v29 = vadd.f32 %v1248_v13, %v1160_v53  ;;  %v1468_v50 = vmax.f32 %v1392_v30, 0.0  ;;  %v4088_v23 = vpop.permute.xlu0 %2022  ;;  %v2243_v13 = vsel %vm2211_vm11, 1, %v3223_v62 }
 0x209   : > { %2316 = vperm.xlu1 %3066, %v2237_v27   ;;  %v1495_v61 = vmax.f32 %v1249_v29, 0.0 }
 0x20a   : > { %v1304_v25 = vpop.f32.mrf.mxu0 }
 0x20b   : > { %v1305_v33 = vadd.f32 %v1304_v25, %v3935_v4  ;;  %v1393_v7 = vpop.f32.mrf.mxu1 }
 0x20c   : > { %v1161_v10 = vpop.f32.mrf.mxu2  ;;  %2331 = vperm.xlu0 %3065, %v2242_v9   ;;  %v4366_v9 = vld [vmem:[#allocation12_spill] sm:$0xff] }
 0x20d   : > { %v1394_v41 = vadd.f32 %v1393_v7, %v1305_v33  ;;  %v1162_v22 = vadd.f32 %v1161_v10, %v3674_v60  ;;  %v1250_v44 = vpop.f32.mrf.mxu3 }
 0x20e   : > { %v4081_v21 = vpop.permute.xlu2 %2019 }
 0x20f   : > { %v1470_v20 = vmax.f32 %v1394_v41, 0.0  ;;  %v1251_v39 = vadd.f32 %v1250_v44, %v1162_v22  ;;  %v4099_v41 = vpop.permute.xlu1 %2025  ;;  %v4101_v44 = vpop.permute.xlu0 %2031 }
 0x211   : > { %v1524_v6 = vpack.c.bf16 %v1470_v20, %v1468_v50  ;;  %v1497_v0 = vmax.f32 %v1251_v39, 0.0  ;;  %1707 = vmatmul.bf16.gmra.mxu2 %v3844_v1  ;;  %2325 = vperm.xlu1 %3066, %v2240_v47   ;;  %v2232_v1 = vsel %vm2200_vm9, 1, %v3223_v62 }
 0x212   : > { %v1307_v54 = vpop.f32.mrf.mxu0  ;;  %2301 = vperm.xlu2 %3067, %v2232_v1   ;;  %v4368_v1 = vld [vmem:[#allocation14_spill] sm:$0xff] }
 0x213   : > { %v1396_v46 = vpop.f32.mrf.mxu1  ;;  %1796 = vmatmul.bf16.gmra.mxu3 %v1524_v6  ;;  %v4074_v18 = vpack.c.bf16 %v1497_v0, %v1495_v61  ;;  %v1308_v24 = vadd.f32 %v1307_v54, %v3935_v4  ;;  %v2238_v61 = vsel %vm2206_vm13, 1, %v3223_v62  ;;  %vm2209_vm14 = vcmp.eq.s32.totalorder %v4368_v1, 1 }
 0x214   : > { %v1164_v49 = vpop.f32.mrf.mxu2  ;;  %2340 = vperm.xlu0 %3065, %v2245_v35  }
 0x215   : > { %v1165_v15 = vadd.f32 %v1164_v49, %v3674_v60  ;;  %v1253_v31 = vpop.f32.mrf.mxu3  ;;  %1346 = vmatmul.bf16.gmra.mxu0 %v3831_v45  ;;  %v1397_v34 = vadd.f32 %v1396_v46, %v1308_v24 }
 0x216   : > { %1435 = vmatmul.bf16.gmra.mxu1 %v3835_v52  ;;  %v4096_v33 = vpop.permute.xlu2 %2028 }
 0x217   : > { %v1254_v3 = vadd.f32 %v1253_v31, %v1165_v15  ;;  %v1472_v25 = vmax.f32 %v1397_v34, 0.0  ;;  %v4114_v15 = vpop.permute.xlu1 %2034  ;;  %v2241_v34 = vsel %vm2209_vm14, 1, %v3223_v62  ;;  %vm2088_vm14 = vcmp.eq.s32.totalorder %v4064_v42, 1 }
 0x219   : > { %2334 = vperm.xlu1 %3066, %v2243_v13   ;;  %v1499_v7 = vmax.f32 %v1254_v3, 0.0 }
 0x21a   : > { %v1309_v45 = vpop.f32.mrf.mxu0  ;;  %2310 = vperm.xlu2 %3067, %v2235_v56  }
 0x21b   : > { %v1310_v52 = vadd.f32 %v1309_v45, %v3935_v4  ;;  %v1398_v53 = vpop.f32.mrf.mxu1  ;;  %v4118_v45 = vpop.permute.xlu0 %2040 }
 0x21c   : > { %v1166_v26 = vpop.f32.mrf.mxu2 }
 0x21d   : > { %v1399_v57 = vadd.f32 %v1398_v53, %v1310_v52  ;;  %v1167_v55 = vadd.f32 %v1166_v26, %v3674_v60  ;;  %v1255_v29 = vpop.f32.mrf.mxu3 }
 0x21e   : > { %v4111_v46 = vpop.permute.xlu2 %2037 }
 0x21f   : > { %v1474_v30 = vmax.f32 %v1399_v57, 0.0  ;;  %v1256_v2 = vadd.f32 %v1255_v29, %v1167_v55 }
 0x221   : > { %v1526_v27 = vpack.c.bf16 %v1474_v30, %v1472_v25  ;;  %v1501_v10 = vmax.f32 %v1256_v2, 0.0  ;;  %1712 = vmatmul.bf16.gmra.mxu2 %v3890_v40  ;;  %v4367_v40 = vld [vmem:[#allocation13_spill] sm:$0xff] }
 0x222   : > { %v1312_v17 = vpop.f32.mrf.mxu0  ;;  %2319 = vperm.xlu2 %3067, %v2238_v61  }
 0x223   : > { %v1401_v22 = vpop.f32.mrf.mxu1  ;;  %1801 = vmatmul.bf16.gmra.mxu3 %v1526_v27  ;;  %v4103_v8 = vpack.c.bf16 %v1501_v10, %v1499_v7  ;;  %v1313_v6 = vadd.f32 %v1312_v17, %v3935_v4  ;;  %v4369_v10 = vld [vmem:[#allocation15_spill] sm:$0xff]  ;;  %v4129_v17 = vpop.permute.xlu1 %2043 }
 0x224   : > { %v1169_v50 = vpop.f32.mrf.mxu2 }
 0x225   : > { %v1170_v20 = vadd.f32 %v1169_v50, %v3674_v60  ;;  %v1258_v39 = vpop.f32.mrf.mxu3  ;;  %1351 = vmatmul.bf16.gmra.mxu0 %v4366_v9  ;;  %v1402_v47 = vadd.f32 %v1401_v22, %v1313_v6  ;;  %v2244_v22 = vsel %vm2212_vm15, 1, %v3223_v62 }
 0x226   : > { %1440 = vmatmul.bf16.gmra.mxu1 %v4367_v40  ;;  %v4124_v2 = vpop.permute.xlu2 %2046 }
 0x227   : > { %v1259_v0 = vadd.f32 %v1258_v39, %v1170_v20  ;;  %v1476_v52 = vmax.f32 %v1402_v47, 0.0  ;;  %v4134_v39 = vpop.permute.xlu0 %2049 }
 0x229   : > { %v1503_v26 = vmax.f32 %v1259_v0, 0.0 }
 0x22a   : > { %v1314_v54 = vpop.f32.mrf.mxu0  ;;  %2328 = vperm.xlu2 %3067, %v2241_v34  }
 0x22b   : > { %v1315_v49 = vadd.f32 %v1314_v54, %v3935_v4  ;;  %v1403_v11 = vpop.f32.mrf.mxu1  ;;  %v4140_v1 = vpop.permute.xlu1 %2052 }
 0x22c   : > { %v1171_v31 = vpop.f32.mrf.mxu2 }
 0x22d   : > { %v1404_v24 = vadd.f32 %v1403_v11, %v1315_v49  ;;  %v1172_v3 = vadd.f32 %v1171_v31, %v3674_v60  ;;  %v1260_v35 = vpop.f32.mrf.mxu3 }
 0x22e   : > { %v4138_v49 = vpop.permute.xlu2 %2055 }
 0x22f   : > { %v1478_v53 = vmax.f32 %v1404_v24, 0.0  ;;  %v1261_v13 = vadd.f32 %v1260_v35, %v1172_v3  ;;  %v4142_v34 = vpop.permute.xlu0 %2058 }
 0x231   : > { %v1528_v57 = vpack.c.bf16 %v1478_v53, %v1476_v52  ;;  %v1505_v55 = vmax.f32 %v1261_v13, 0.0  ;;  %1717 = vmatmul.bf16.gmra.mxu2 %v3939_v48  ;;  %v4370_v48 = vld [vmem:[#allocation16_spill] sm:$0xff] }
 0x232   : > { %v1317_v29 = vpop.f32.mrf.mxu0  ;;  %2337 = vperm.xlu2 %3067, %v2244_v22  }
 0x233   : > { %v1406_v56 = vpop.f32.mrf.mxu1  ;;  %1806 = vmatmul.bf16.gmra.mxu3 %v1528_v57  ;;  %v4122_v25 = vpack.c.bf16 %v1505_v55, %v1503_v26  ;;  %v1318_v50 = vadd.f32 %v1317_v29, %v3935_v4 }
 0x234   : > { %v1174_v30 = vpop.f32.mrf.mxu2 }
 0x235   : > { %v1175_v7 = vadd.f32 %v1174_v30, %v3674_v60  ;;  %v1263_v27 = vpop.f32.mrf.mxu3  ;;  %1356 = vmatmul.bf16.gmra.mxu0 %v4369_v10  ;;  %v1407_v61 = vadd.f32 %v1406_v56, %v1318_v50 }
 0x236   : > { %1445 = vmatmul.bf16.gmra.mxu1 %v4370_v48  ;;  %v4149_v30 = vpop.permute.xlu2 %2064 }
 0x237   : > { %v1264_v20 = vadd.f32 %v1263_v27, %v1175_v7  ;;  %v1480_v62 = vmax.f32 %v1407_v61, 0.0  ;;  %v4151_v7 = vpop.permute.xlu1 %2061  ;;  %v4153_v22 = vpop.permute.xlu0 %2067 }
 0x239   : > { %v1507_v24 = vmax.f32 %v1264_v20, 0.0 }
 0x23a   : > { %v1319_v9 = vpop.f32.mrf.mxu0 }
 0x23b   : > { %v1320_v36 = vadd.f32 %v1319_v9, %v3935_v4  ;;  %v1408_v40 = vpop.f32.mrf.mxu1 }
 0x23c   : > { %v1176_v6 = vpop.f32.mrf.mxu2 }
 0x23d   : > { %v1409_v0 = vadd.f32 %v1408_v40, %v1320_v36  ;;  %v1177_v54 = vadd.f32 %v1176_v6, %v3674_v60  ;;  %v1265_v47 = vpop.f32.mrf.mxu3 }
 0x23f   : > { %v1482_v11 = vmax.f32 %v1409_v0, 0.0  ;;  %v1266_v31 = vadd.f32 %v1265_v47, %v1177_v54 }
 0x241   : > { %v1530_v3 = vpack.c.bf16 %v1482_v11, %v1480_v62  ;;  %v1509_v35 = vmax.f32 %v1266_v31, 0.0  ;;  %1722 = vmatmul.bf16.gmra.mxu2 %v3969_v16  ;;  %v4161_v62 = vld [vmem:[%s4346_s7] ss:$0 sm:$0xff]  ;;  %v4163_v11 = vpop.permute.xlu2 %2073 }
 0x242   : > { %v1322_v52 = vpop.f32.mrf.mxu0 }
 0x243   : > { %v1411_v53 = vpop.f32.mrf.mxu1  ;;  %1811 = vmatmul.bf16.gmra.mxu3 %v1530_v3  ;;  %v4145_v13 = vpack.c.bf16 %v1509_v35, %v1507_v24  ;;  %v1323_v29 = vadd.f32 %v1322_v52, %v3935_v4  ;;  %v4169_v52 = vpop.permute.xlu0 %2076 }
 0x244   : > { %v1179_v26 = vpop.f32.mrf.mxu2 }
 0x245   : > { %v1180_v57 = vadd.f32 %v1179_v26, %v3674_v60  ;;  %v1268_v55 = vpop.f32.mrf.mxu3  ;;  %v1412_v10 = vadd.f32 %v1411_v53, %v1323_v29 }
 0x247   : > { %v1269_v56 = vadd.f32 %v1268_v55, %v1180_v57  ;;  %v1484_v36 = vmax.f32 %v1412_v10, 0.0 }
 0x249   : > { %v1511_v0 = vmax.f32 %v1269_v56, 0.0 }
 0x24a   : > { %v1324_v27 = vpop.f32.mrf.mxu0 }
 0x24b   : > { %v1325_v16 = vadd.f32 %v1324_v27, %v3935_v4  ;;  %v1413_v48 = vpop.f32.mrf.mxu1 }
 0x24c   : > { %v1181_v50 = vpop.f32.mrf.mxu2 }
 0x24d   : > { %v1414_v20 = vadd.f32 %v1413_v48, %v1325_v16  ;;  %v1182_v9 = vadd.f32 %v1181_v50, %v3674_v60  ;;  %v1270_v61 = vpop.f32.mrf.mxu3  ;;  %v4165_v60 = vpop.permute.xlu1 %2070 }
 0x24e   : > { %v2248_v50 = vpop.permute.xlu2 %2247 }
 0x24f   : > { %v1486_v40 = vmax.f32 %v1414_v20, 0.0  ;;  %v1271_v6 = vadd.f32 %v1270_v61, %v1182_v9  ;;  %vm2342_vm2 = vcmp.eq.s32.totalorder %v2248_v50, 1 }
 0x251   : > { %v1532_v54 = vpack.c.bf16 %v1486_v40, %v1484_v36  ;;  %v1513_v47 = vmax.f32 %v1271_v6, 0.0  ;;  %1727 = vmatmul.bf16.gmra.mxu2 %v3993_v43  ;;  %v2251_v6 = vpop.permute.xlu0 %2250 }
 0x252   : > { %v1327_v31 = vpop.f32.mrf.mxu0  ;;  %vm2343_vm3 = vcmp.eq.s32.totalorder %v2251_v6, 1 }
 0x253   : > { %v1416_v24 = vpop.f32.mrf.mxu1  ;;  %1816 = vmatmul.bf16.gmra.mxu3 %v1532_v54  ;;  %v4167_v3 = vpack.c.bf16 %v1513_v47, %v1511_v0  ;;  %v1328_v26 = vadd.f32 %v1327_v31, %v3935_v4 }
 0x254   : > { %v1688_v35 = vpop.f32.mrf.mxu2 }
 0x255   : > { %v1689_v53 = vadd.f32 %v4161_v62, %v1688_v35  ;;  %v1417_v56 = vadd.f32 %v1416_v24, %v1328_v26  ;;  %v4176_v61 = vpop.permute.xlu1 %2079 }
 0x256   : > { %v1777_v43 = vpop.f32.mrf.mxu3 }
 0x257   : > { %v1778_v57 = vadd.f32 %v1777_v43, %v1689_v53  ;;  %v1488_v40 = vmax.f32 %v1417_v56, 0.0 }
 0x259   : > { %v1857_v55 = vmax.f32 %v1778_v57, 0.0 }
 0x25a   : > { %v1329_v29 = vpop.f32.mrf.mxu0 }
 0x25b   : > { %v2113_v27 = vsel %vm2081_vm0, %v1857_v55, -3.4028235e+38  ;;  %v1330_v10 = vadd.f32 %v1329_v29, %v3935_v4  ;;  %v1418_v16 = vpop.f32.mrf.mxu1  ;;  %v2374_v24 = vsel %vm2342_vm2, %v1857_v55, -3.4028235e+38  ;;  %vm2089_vm0 = vcmp.eq.s32.totalorder %v4060_v37, 1 }
 0x25c   : > { %v1690_v48 = vpop.f32.mrf.mxu2  ;;  %vm2090_vm2 = vcmp.eq.s32.totalorder %v4068_v59, 1 }
 0x25d   : > { %v1419_v20 = vadd.f32 %v1418_v16, %v1330_v10  ;;  %v1691_v9 = vadd.f32 %v4161_v62, %v1690_v48  ;;  %v2254_v48 = vpop.permute.xlu1 %2253 }
 0x25e   : > { %v1779_v36 = vpop.f32.mrf.mxu3  ;;  %vm2344_vm5 = vcmp.eq.s32.totalorder %v2254_v48, 1 }
 0x25f   : > { %v1490_v0 = vmax.f32 %v1419_v20, 0.0  ;;  %v1780_v54 = vadd.f32 %v1779_v36, %v1691_v9 }
 0x261   : > { %v1534_v5 = vpack.c.bf16 %v1490_v0, %v1488_v40  ;;  %v1858_v47 = vmax.f32 %v1780_v54, 0.0  ;;  %1732 = vmatmul.bf16.gmra.mxu2 %v4014_v19 }
 0x262   : > { %v1332_v31 = vpop.f32.mrf.mxu0 }
 0x263   : > { %v2114_v35 = vsel %vm2082_vm1, %v1858_v47, -3.4028235e+38  ;;  %v2375_v53 = vsel %vm2343_vm3, %v1858_v47, -3.4028235e+38  ;;  %v1421_v43 = vpop.f32.mrf.mxu1  ;;  %1821 = vmatmul.bf16.gmra.mxu3 %v1534_v5  ;;  %v1333_v28 = vadd.f32 %v1332_v31, %v3935_v4 }
 0x264   : > { %v2145_v26 = vmax.f32 %v2113_v27, %v2114_v35  ;;  %v2406_v57 = vmax.f32 %v2374_v24, %v2375_v53  ;;  %v1693_v29 = vpop.f32.mrf.mxu2  ;;  %v2257_v24 = vpop.permute.xlu2 %2256 }
 0x265   : > { %v1694_v56 = vadd.f32 %v4161_v62, %v1693_v29  ;;  %v1422_v55 = vadd.f32 %v1421_v43, %v1333_v28  ;;  %vm2345_vm7 = vcmp.eq.s32.totalorder %v2257_v24, 1 }
 0x266   : > { %v1782_v10 = vpop.f32.mrf.mxu3 }
 0x267   : > { %v1783_v16 = vadd.f32 %v1782_v10, %v1694_v56  ;;  %v1492_v31 = vmax.f32 %v1422_v55, 0.0 }
 0x269   : > { %v1859_v19 = vmax.f32 %v1783_v16, 0.0 }
 0x26a   : > { %v1334_v50 = vpop.f32.mrf.mxu0 }
 0x26b   : > { %v2115_v20 = vsel %vm2083_vm4, %v1859_v19, -3.4028235e+38  ;;  %v2376_v9 = vsel %vm2344_vm5, %v1859_v19, -3.4028235e+38  ;;  %v1335_v36 = vadd.f32 %v1334_v50, %v3935_v4  ;;  %v1423_v27 = vpop.f32.mrf.mxu1  ;;  %v2260_v50 = vpop.permute.xlu0 %2259  ;;  %vm2091_vm4 = vcmp.eq.s32.totalorder %v4085_v14, 1 }
 0x26c   : > { %v2146_v40 = vmax.f32 %v2115_v20, %v2145_v26  ;;  %v2407_v6 = vmax.f32 %v2376_v9, %v2406_v57  ;;  %v1695_v0 = vpop.f32.mrf.mxu2  ;;  %vm2346_vm9 = vcmp.eq.s32.totalorder %v2260_v50, 1 }
 0x26d   : > { %v1424_v54 = vadd.f32 %v1423_v27, %v1335_v36  ;;  %v1696_v5 = vadd.f32 %v4161_v62, %v1695_v0 }
 0x26e   : > { %v1784_v47 = vpop.f32.mrf.mxu3 }
 0x26f   : > { %v1494_v35 = vmax.f32 %v1424_v54, 0.0  ;;  %v1785_v38 = vadd.f32 %v1784_v47, %v1696_v5 }
 0x271   : > { %v1536_v53 = vpack.c.bf16 %v1494_v35, %v1492_v31  ;;  %v1860_v43 = vmax.f32 %v1785_v38, 0.0  ;;  %1737 = vmatmul.bf16.gmra.mxu2 %v4045_v12  ;;  %v2263_v35 = vpop.permute.xlu1 %2262 }
 0x272   : > { %v1337_v29 = vpop.f32.mrf.mxu0  ;;  %vm2347_vm11 = vcmp.eq.s32.totalorder %v2263_v35, 1 }
 0x273   : > { %v2116_v56 = vsel %vm2084_vm6, %v1860_v43, -3.4028235e+38  ;;  %v2377_v26 = vsel %vm2345_vm7, %v1860_v43, -3.4028235e+38  ;;  %v1426_v57 = vpop.f32.mrf.mxu1  ;;  %1826 = vmatmul.bf16.gmra.mxu3 %v1536_v53  ;;  %v1338_v55 = vadd.f32 %v1337_v29, %v3935_v4  ;;  %vm2092_vm6 = vcmp.eq.s32.totalorder %v4081_v21, 1 }
 0x274   : > { %v2147_v10 = vmax.f32 %v2116_v56, %v2146_v40  ;;  %v2408_v28 = vmax.f32 %v2377_v26, %v2407_v6  ;;  %v1698_v16 = vpop.f32.mrf.mxu2 }
 0x275   : > { %v1699_v48 = vadd.f32 %v4161_v62, %v1698_v16  ;;  %v1427_v9 = vadd.f32 %v1426_v57, %v1338_v55  ;;  %v2266_v55 = vpop.permute.xlu2 %2265 }
 0x276   : > { %v1787_v19 = vpop.f32.mrf.mxu3  ;;  %vm2348_vm13 = vcmp.eq.s32.totalorder %v2266_v55, 1 }
 0x277   : > { %v1788_v51 = vadd.f32 %v1787_v19, %v1699_v48  ;;  %v1496_v38 = vmax.f32 %v1427_v9, 0.0 }
 0x279   : > { %v1861_v20 = vmax.f32 %v1788_v51, 0.0 }
 0x27a   : > { %v1339_v12 = vpop.f32.mrf.mxu0 }
 0x27b   : > { %v2117_v36 = vsel %vm2085_vm8, %v1861_v20, -3.4028235e+38  ;;  %v2378_v27 = vsel %vm2346_vm9, %v1861_v20, -3.4028235e+38  ;;  %v1340_v0 = vadd.f32 %v1339_v12, %v3935_v4  ;;  %v1428_v40 = vpop.f32.mrf.mxu1  ;;  %vm2093_vm8 = vcmp.eq.s32.totalorder %v4088_v23, 1 }
 0x27c   : > { %v2148_v6 = vmax.f32 %v2117_v36, %v2147_v10  ;;  %v2409_v54 = vmax.f32 %v2378_v27, %v2408_v28  ;;  %v1700_v5 = vpop.f32.mrf.mxu2 }
 0x27d   : > { %v1429_v47 = vadd.f32 %v1428_v40, %v1340_v0  ;;  %v1701_v31 = vadd.f32 %v4161_v62, %v1700_v5 }
 0x27e   : > { %v1789_v24 = vpop.f32.mrf.mxu3 }
 0x27f   : > { %v1498_v53 = vmax.f32 %v1429_v47, 0.0  ;;  %v1790_v32 = vadd.f32 %v1789_v24, %v1701_v31  ;;  %v2269_v24 = vpop.permute.xlu0 %2268 }
 0x280   : > { %vm2349_vm15 = vcmp.eq.s32.totalorder %v2269_v24, 1 }
 0x281   : > { %v1538_v43 = vpack.c.bf16 %v1498_v53, %v1496_v38  ;;  %v1862_v29 = vmax.f32 %v1790_v32, 0.0  ;;  %1742 = vmatmul.bf16.gmra.mxu2 %v4074_v18 }
 0x282   : > { %v1342_v56 = vpop.f32.mrf.mxu0 }
 0x283   : > { %v2118_v26 = vsel %vm2086_vm10, %v1862_v29, -3.4028235e+38  ;;  %v2379_v57 = vsel %vm2347_vm11, %v1862_v29, -3.4028235e+38  ;;  %v1431_v10 = vpop.f32.mrf.mxu1  ;;  %1831 = vmatmul.bf16.gmra.mxu3 %v1538_v43  ;;  %v1343_v51 = vadd.f32 %v1342_v56, %v3935_v4  ;;  %vm2094_vm10 = vcmp.eq.s32.totalorder %v4099_v41, 1 }
 0x284   : > { %v2149_v28 = vmax.f32 %v2118_v26, %v2148_v6  ;;  %v2410_v16 = vmax.f32 %v2379_v57, %v2409_v54  ;;  %v1703_v48 = vpop.f32.mrf.mxu2 }
 0x285   : > { %v1704_v19 = vadd.f32 %v4161_v62, %v1703_v48  ;;  %v1432_v12 = vadd.f32 %v1431_v10, %v1343_v51 }
 0x286   : > { %v1792_v50 = vpop.f32.mrf.mxu3 }
 0x287   : > { %v1793_v63 = vadd.f32 %v1792_v50, %v1704_v19  ;;  %v1500_v35 = vmax.f32 %v1432_v12, 0.0  ;;  %v2272_v19 = vpop.permute.xlu1 %2271 }
 0x288   : > { %vm2350_vm1 = vcmp.eq.s32.totalorder %v2272_v19, 1 }
 0x289   : > { %v1863_v20 = vmax.f32 %v1793_v63, 0.0 }
 0x28a   : > { %v1344_v18 = vpop.f32.mrf.mxu0 }
 0x28b   : > { %v2119_v9 = vsel %vm2087_vm12, %v1863_v20, -3.4028235e+38  ;;  %v2380_v36 = vsel %vm2348_vm13, %v1863_v20, -3.4028235e+38  ;;  %v1345_v27 = vadd.f32 %v1344_v18, %v3935_v4  ;;  %v1433_v0 = vpop.f32.mrf.mxu1  ;;  %vm2095_vm12 = vcmp.eq.s32.totalorder %v4096_v33, 1 }
 0x28c   : > { %v2150_v40 = vmax.f32 %v2119_v9, %v2149_v28  ;;  %v2411_v6 = vmax.f32 %v2380_v36, %v2410_v16  ;;  %v1705_v54 = vpop.f32.mrf.mxu2 }
 0x28d   : > { %v1434_v5 = vadd.f32 %v1433_v0, %v1345_v27  ;;  %v1706_v47 = vadd.f32 %v4161_v62, %v1705_v54  ;;  %v2275_v54 = vpop.permute.xlu2 %2274 }
 0x28e   : > { %v1794_v31 = vpop.f32.mrf.mxu3  ;;  %vm2351_vm3 = vcmp.eq.s32.totalorder %v2275_v54, 1 }
 0x28f   : > { %v1502_v38 = vmax.f32 %v1434_v5, 0.0  ;;  %v1795_v58 = vadd.f32 %v1794_v31, %v1706_v47  ;;  %v2281_v14 = vpop.permute.xlu1 %2280 }
 0x290   : > { %vm2353_vm7 = vcmp.eq.s32.totalorder %v2281_v14, 1 }
 0x291   : > { %v1540_v53 = vpack.c.bf16 %v1502_v38, %v1500_v35  ;;  %v1864_v32 = vmax.f32 %v1795_v58, 0.0  ;;  %1747 = vmatmul.bf16.gmra.mxu2 %v4103_v8 }
 0x292   : > { %v1347_v43 = vpop.f32.mrf.mxu0 }
 0x293   : > { %v2120_v29 = vsel %vm2088_vm14, %v1864_v32, -3.4028235e+38  ;;  %v2381_v56 = vsel %vm2349_vm15, %v1864_v32, -3.4028235e+38  ;;  %v1436_v26 = vpop.f32.mrf.mxu1  ;;  %1836 = vmatmul.bf16.gmra.mxu3 %v1540_v53  ;;  %v1348_v50 = vadd.f32 %v1347_v43, %v3935_v4  ;;  %vm2096_vm14 = vcmp.eq.s32.totalorder %v4101_v44, 1 }
 0x294   : > { %v2151_v57 = vmax.f32 %v2120_v29, %v2150_v40  ;;  %v2412_v10 = vmax.f32 %v2381_v56, %v2411_v6  ;;  %v1708_v28 = vpop.f32.mrf.mxu2 }
 0x295   : > { %v1709_v16 = vadd.f32 %v4161_v62, %v1708_v28  ;;  %v1437_v51 = vadd.f32 %v1436_v26, %v1348_v50 }
 0x296   : > { %v1797_v48 = vpop.f32.mrf.mxu3 }
 0x297   : > { %v1798_v42 = vadd.f32 %v1797_v48, %v1709_v16  ;;  %v1504_v5 = vmax.f32 %v1437_v51, 0.0 }
 0x299   : > { %v1865_v55 = vmax.f32 %v1798_v42, 0.0 }
 0x29a   : > { %v1349_v8 = vpop.f32.mrf.mxu0 }
 0x29b   : > { %v2121_v63 = vsel %vm2089_vm0, %v1865_v55, -3.4028235e+38  ;;  %v2382_v20 = vsel %vm2350_vm1, %v1865_v55, -3.4028235e+38  ;;  %v1350_v18 = vadd.f32 %v1349_v8, %v3935_v4  ;;  %v1438_v12 = vpop.f32.mrf.mxu1  ;;  %vm2097_vm0 = vcmp.eq.s32.totalorder %v4114_v15, 1 }
 0x29c   : > { %v2152_v9 = vmax.f32 %v2121_v63, %v2151_v57  ;;  %v2413_v36 = vmax.f32 %v2382_v20, %v2412_v10  ;;  %v1710_v27 = vpop.f32.mrf.mxu2  ;;  %v2278_v57 = vpop.permute.xlu0 %2277 }
 0x29d   : > { %v1439_v0 = vadd.f32 %v1438_v12, %v1350_v18  ;;  %v1711_v40 = vadd.f32 %v4161_v62, %v1710_v27  ;;  %vm2352_vm5 = vcmp.eq.s32.totalorder %v2278_v57, 1 }
 0x29e   : > { %v1799_v6 = vpop.f32.mrf.mxu3 }
 0x29f   : > { %v1506_v47 = vmax.f32 %v1439_v0, 0.0  ;;  %v1800_v37 = vadd.f32 %v1799_v6, %v1711_v40 }
 0x2a1   : > { %v1542_v31 = vpack.c.bf16 %v1506_v47, %v1504_v5  ;;  %v1866_v24 = vmax.f32 %v1800_v37, 0.0  ;;  %1752 = vmatmul.bf16.gmra.mxu2 %v4122_v25 }
 0x2a2   : > { %v1352_v35 = vpop.f32.mrf.mxu0 }
 0x2a3   : > { %v2122_v38 = vsel %vm2090_vm2, %v1866_v24, -3.4028235e+38  ;;  %v2383_v58 = vsel %vm2351_vm3, %v1866_v24, -3.4028235e+38  ;;  %v1441_v53 = vpop.f32.mrf.mxu1  ;;  %1841 = vmatmul.bf16.gmra.mxu3 %v1542_v31  ;;  %v1353_v10 = vadd.f32 %v1352_v35, %v3935_v4  ;;  %vm2098_vm2 = vcmp.eq.s32.totalorder %v4111_v46, 1 }
 0x2a4   : > { %v2153_v32 = vmax.f32 %v2122_v38, %v2152_v9  ;;  %v2414_v43 = vmax.f32 %v2383_v58, %v2413_v36  ;;  %v1713_v29 = vpop.f32.mrf.mxu2 }
 0x2a5   : > { %v1714_v56 = vadd.f32 %v4161_v62, %v1713_v29  ;;  %v1442_v16 = vadd.f32 %v1441_v53, %v1353_v10  ;;  %v2284_v53 = vpop.permute.xlu2 %2283 }
 0x2a6   : > { %v1802_v26 = vpop.f32.mrf.mxu3  ;;  %vm2354_vm9 = vcmp.eq.s32.totalorder %v2284_v53, 1 }
 0x2a7   : > { %v1803_v59 = vadd.f32 %v1802_v26, %v1714_v56  ;;  %v1508_v12 = vmax.f32 %v1442_v16, 0.0 }
 0x2a9   : > { %v1867_v28 = vmax.f32 %v1803_v59, 0.0 }
 0x2aa   : > { %v1354_v25 = vpop.f32.mrf.mxu0 }
 0x2ab   : > { %v2123_v48 = vsel %vm2091_vm4, %v1867_v28, -3.4028235e+38  ;;  %v2384_v19 = vsel %vm2352_vm5, %v1867_v28, -3.4028235e+38  ;;  %v1355_v50 = vadd.f32 %v1354_v25, %v3935_v4  ;;  %v1443_v42 = vpop.f32.mrf.mxu1  ;;  %vm2099_vm4 = vcmp.eq.s32.totalorder %v4118_v45, 1 }
 0x2ac   : > { %v2154_v55 = vmax.f32 %v2123_v48, %v2153_v32  ;;  %v2415_v8 = vmax.f32 %v2384_v19, %v2414_v43  ;;  %v1715_v51 = vpop.f32.mrf.mxu2 }
 0x2ad   : > { %v1444_v63 = vadd.f32 %v1443_v42, %v1355_v50  ;;  %v1716_v20 = vadd.f32 %v4161_v62, %v1715_v51  ;;  %v2287_v42 = vpop.permute.xlu0 %2286 }
 0x2ae   : > { %v1804_v18 = vpop.f32.mrf.mxu3  ;;  %vm2355_vm11 = vcmp.eq.s32.totalorder %v2287_v42, 1 }
 0x2af   : > { %v1510_v9 = vmax.f32 %v1444_v63, 0.0  ;;  %v1805_v36 = vadd.f32 %v1804_v18, %v1716_v20 }
 0x2b1   : > { %v1544_v27 = vpack.c.bf16 %v1510_v9, %v1508_v12  ;;  %v1868_v0 = vmax.f32 %v1805_v36, 0.0  ;;  %1757 = vmatmul.bf16.gmra.mxu2 %v4145_v13  ;;  %v2290_v36 = vpop.permute.xlu1 %2289 }
 0x2b2   : > { %v1357_v40 = vpop.f32.mrf.mxu0  ;;  %vm2356_vm13 = vcmp.eq.s32.totalorder %v2290_v36, 1 }
 0x2b3   : > { %v2124_v6 = vsel %vm2092_vm6, %v1868_v0, -3.4028235e+38  ;;  %v2385_v54 = vsel %vm2353_vm7, %v1868_v0, -3.4028235e+38  ;;  %v1446_v5 = vpop.f32.mrf.mxu1  ;;  %1846 = vmatmul.bf16.gmra.mxu3 %v1544_v27  ;;  %v1358_v38 = vadd.f32 %v1357_v40, %v3935_v4  ;;  %vm2100_vm6 = vcmp.eq.s32.totalorder %v4129_v17, 1 }
 0x2b4   : > { %v2155_v47 = vmax.f32 %v2124_v6, %v2154_v55  ;;  %v2416_v37 = vmax.f32 %v2385_v54, %v2415_v8  ;;  %v1718_v31 = vpop.f32.mrf.mxu2 }
 0x2b5   : > { %v1719_v24 = vadd.f32 %v4161_v62, %v1718_v31  ;;  %v1447_v13 = vadd.f32 %v1446_v5, %v1358_v38 }
 0x2b6   : > { %v1807_v35 = vpop.f32.mrf.mxu3 }
 0x2b7   : > { %v1808_v58 = vadd.f32 %v1807_v35, %v1719_v24  ;;  %v1512_v48 = vmax.f32 %v1447_v13, 0.0 }
 0x2b9   : > { %v1869_v32 = vmax.f32 %v1808_v58, 0.0 }
 0x2ba   : > { %v1359_v21 = vpop.f32.mrf.mxu0 }
 0x2bb   : > { %v2125_v43 = vsel %vm2093_vm8, %v1869_v32, -3.4028235e+38  ;;  %v2386_v29 = vsel %vm2354_vm9, %v1869_v32, -3.4028235e+38  ;;  %v1360_v56 = vadd.f32 %v1359_v21, %v3935_v4  ;;  %v1448_v10 = vpop.f32.mrf.mxu1  ;;  %v2296_v21 = vpop.permute.xlu0 %2295  ;;  %vm2101_vm8 = vcmp.eq.s32.totalorder %v4124_v2, 1 }
 0x2bc   : > { %v2156_v26 = vmax.f32 %v2125_v43, %v2155_v47  ;;  %v2417_v57 = vmax.f32 %v2386_v29, %v2416_v37  ;;  %v1720_v59 = vpop.f32.mrf.mxu2  ;;  %v2293_v47 = vpop.permute.xlu2 %2292  ;;  %vm2358_vm1 = vcmp.eq.s32.totalorder %v2296_v21, 1 }
 0x2bd   : > { %v1449_v28 = vadd.f32 %v1448_v10, %v1360_v56  ;;  %v1721_v25 = vadd.f32 %v4161_v62, %v1720_v59  ;;  %vm2357_vm15 = vcmp.eq.s32.totalorder %v2293_v47, 1 }
 0x2be   : > { %v1809_v16 = vpop.f32.mrf.mxu3 }
 0x2bf   : > { %v1514_v19 = vmax.f32 %v1449_v28, 0.0  ;;  %v1810_v50 = vadd.f32 %v1809_v16, %v1721_v25  ;;  %v2299_v28 = vpop.permute.xlu1 %2298 }
 0x2c0   : > { %vm2359_vm3 = vcmp.eq.s32.totalorder %v2299_v28, 1 }
 0x2c1   : > { %v1546_v23 = vpack.c.bf16 %v1514_v19, %v1512_v48  ;;  %v1870_v55 = vmax.f32 %v1810_v50, 0.0  ;;  %1762 = vmatmul.bf16.gmra.mxu2 %v4167_v3 }
 0x2c3   : > { %v2126_v4 = vsel %vm2094_vm10, %v1870_v55, -3.4028235e+38  ;;  %v2387_v8 = vsel %vm2355_vm11, %v1870_v55, -3.4028235e+38  ;;  %1851 = vmatmul.bf16.gmra.mxu3 %v1546_v23  ;;  %vm2102_vm10 = vcmp.eq.s32.totalorder %v4134_v39, 1  ;;  %vm2103_vm11 = vcmp.eq.s32.totalorder %v4140_v1, 1 }
 0x2c4   : > { %v2157_v51 = vmax.f32 %v2126_v4, %v2156_v26  ;;  %v2418_v63 = vmax.f32 %v2387_v8, %v2417_v57  ;;  %v1723_v20 = vpop.f32.mrf.mxu2  ;;  %v2302_v4 = vpop.permute.xlu2 %2301 }
 0x2c5   : > { %v1724_v18 = vadd.f32 %v4161_v62, %v1723_v20  ;;  %vm2360_vm5 = vcmp.eq.s32.totalorder %v2302_v4, 1 }
 0x2c6   : > { %v1812_v12 = vpop.f32.mrf.mxu3 }
 0x2c7   : > { %v1813_v9 = vadd.f32 %v1812_v12, %v1724_v18  ;;  %v2308_v47 = vpop.permute.xlu1 %2307 }
 0x2c8   : > { %vm2362_vm9 = vcmp.eq.s32.totalorder %v2308_v47, 1 }
 0x2c9   : > { %v1871_v14 = vmax.f32 %v1813_v9, 0.0 }
 0x2cb   : > { %v2127_v27 = vsel %vm2095_vm12, %v1871_v14, -3.4028235e+38  ;;  %v2388_v3 = vsel %vm2356_vm13, %v1871_v14, -3.4028235e+38  ;;  %v2305_v14 = vpop.permute.xlu0 %2304  ;;  %vm2104_vm12 = vcmp.eq.s32.totalorder %v4138_v49, 1  ;;  %vm2105_vm13 = vcmp.eq.s32.totalorder %v4142_v34, 1 }
 0x2cc   : > { %v2158_v0 = vmax.f32 %v2127_v27, %v2157_v51  ;;  %v2419_v41 = vmax.f32 %v2388_v3, %v2418_v63  ;;  %v1725_v40 = vpop.f32.mrf.mxu2  ;;  %vm2361_vm7 = vcmp.eq.s32.totalorder %v2305_v14, 1 }
 0x2cd   : > { %v1726_v6 = vadd.f32 %v4161_v62, %v1725_v40 }
 0x2ce   : > { %v1814_v54 = vpop.f32.mrf.mxu3 }
 0x2cf   : > { %v1815_v5 = vadd.f32 %v1814_v54, %v1726_v6 }
 0x2d1   : > { %v1872_v37 = vmax.f32 %v1815_v5, 0.0 }
 0x2d3   : > { %v2128_v31 = vsel %vm2096_vm14, %v1872_v37, -3.4028235e+38  ;;  %v2389_v24 = vsel %vm2357_vm15, %v1872_v37, -3.4028235e+38  ;;  %vm2106_vm14 = vcmp.eq.s32.totalorder %v4151_v7, 1  ;;  %vm2107_vm15 = vcmp.eq.s32.totalorder %v4149_v30, 1 }
 0x2d4   : > { %v2159_v35 = vmax.f32 %v2128_v31, %v2158_v0  ;;  %v2420_v38 = vmax.f32 %v2389_v24, %v2419_v41  ;;  %v1728_v33 = vpop.f32.mrf.mxu2 }
 0x2d5   : > { %v1729_v58 = vadd.f32 %v4161_v62, %v1728_v33 }
 0x2d6   : > { %v1817_v53 = vpop.f32.mrf.mxu3 }
 0x2d7   : > { %v1818_v32 = vadd.f32 %v1817_v53, %v1729_v58 }
 0x2d9   : > { %v1873_v13 = vmax.f32 %v1818_v32, 0.0 }
 0x2db   : > { %v2129_v43 = vsel %vm2097_vm0, %v1873_v13, -3.4028235e+38  ;;  %v2390_v29 = vsel %vm2358_vm1, %v1873_v13, -3.4028235e+38  ;;  %vm2108_vm0 = vcmp.eq.s32.totalorder %v4153_v22, 1  ;;  %vm2109_vm1 = vcmp.eq.s32.totalorder %v4165_v60, 1 }
 0x2dc   : > { %v2160_v56 = vmax.f32 %v2129_v43, %v2159_v35  ;;  %v2421_v26 = vmax.f32 %v2390_v29, %v2420_v38  ;;  %v1730_v44 = vpop.f32.mrf.mxu2 }
 0x2dd   : > { %v1731_v57 = vadd.f32 %v4161_v62, %v1730_v44 }
 0x2de   : > { %v1819_v10 = vpop.f32.mrf.mxu3 }
 0x2df   : > { %v1820_v59 = vadd.f32 %v1819_v10, %v1731_v57 }
 0x2e1   : > { %v1874_v25 = vmax.f32 %v1820_v59, 0.0 }
 0x2e3   : > { %v2130_v16 = vsel %vm2098_vm2, %v1874_v25, -3.4028235e+38  ;;  %v2391_v48 = vsel %vm2359_vm3, %v1874_v25, -3.4028235e+38 }
 0x2e4   : > { %v2161_v19 = vmax.f32 %v2130_v16, %v2160_v56  ;;  %v2422_v50 = vmax.f32 %v2391_v48, %v2421_v26  ;;  %v1733_v15 = vpop.f32.mrf.mxu2 }
 0x2e5   : > { %v1734_v42 = vadd.f32 %v4161_v62, %v1733_v15 }
 0x2e6   : > { %v1822_v23 = vpop.f32.mrf.mxu3 }
 0x2e7   : > { %v1823_v55 = vadd.f32 %v1822_v23, %v1734_v42 }
 0x2e9   : > { %v1875_v8 = vmax.f32 %v1823_v55, 0.0 }
 0x2eb   : > { %v2131_v51 = vsel %vm2099_vm4, %v1875_v8, -3.4028235e+38  ;;  %v2392_v63 = vsel %vm2360_vm5, %v1875_v8, -3.4028235e+38  ;;  %vm2110_vm5 = vcmp.eq.s32.totalorder %v4163_v11, 1 }
 0x2ec   : > { %v2162_v20 = vmax.f32 %v2131_v51, %v2161_v19  ;;  %v2423_v18 = vmax.f32 %v2392_v63, %v2422_v50  ;;  %v1735_v46 = vpop.f32.mrf.mxu2 }
 0x2ed   : > { %v1736_v12 = vadd.f32 %v4161_v62, %v1735_v46 }
 0x2ee   : > { %v1824_v9 = vpop.f32.mrf.mxu3 }
 0x2ef   : > { %v1825_v36 = vadd.f32 %v1824_v9, %v1736_v12 }
 0x2f1   : > { %v1876_v27 = vmax.f32 %v1825_v36, 0.0 }
 0x2f3   : > { %v2132_v3 = vsel %vm2100_vm6, %v1876_v27, -3.4028235e+38  ;;  %v2393_v0 = vsel %vm2361_vm7, %v1876_v27, -3.4028235e+38 }
 0x2f4   : > { %v2163_v41 = vmax.f32 %v2132_v3, %v2162_v20  ;;  %v2424_v40 = vmax.f32 %v2393_v0, %v2423_v18  ;;  %v1738_v45 = vpop.f32.mrf.mxu2  ;;  %v2311_v0 = vpop.permute.xlu2 %2310 }
 0x2f5   : > { %v1739_v6 = vadd.f32 %v4161_v62, %v1738_v45  ;;  %v2314_v45 = vpop.permute.xlu0 %2313  ;;  %vm2363_vm2 = vcmp.eq.s32.totalorder %v2311_v0, 1 }
 0x2f6   : > { %v1827_v54 = vpop.f32.mrf.mxu3  ;;  %vm2364_vm3 = vcmp.eq.s32.totalorder %v2314_v45, 1 }
 0x2f7   : > { %v1828_v5 = vadd.f32 %v1827_v54, %v1739_v6 }
 0x2f9   : > { %v1877_v37 = vmax.f32 %v1828_v5, 0.0 }
 0x2fb   : > { %v2133_v31 = vsel %vm2101_vm8, %v1877_v37, -3.4028235e+38  ;;  %v2394_v24 = vsel %vm2362_vm9, %v1877_v37, -3.4028235e+38  ;;  %v2317_v37 = vpop.permute.xlu1 %2316 }
 0x2fc   : > { %v2164_v35 = vmax.f32 %v2133_v31, %v2163_v41  ;;  %v4236_v38 = vmax.f32 %v2394_v24, %v2424_v40  ;;  %v1740_v17 = vpop.f32.mrf.mxu2  ;;  %v2320_v24 = vpop.permute.xlu2 %2319  ;;  %vm2365_vm4 = vcmp.eq.s32.totalorder %v2317_v37, 1 }
 0x2fd   : > { %v1741_v33 = vadd.f32 %v4161_v62, %v1740_v17  ;;  %vm2366_vm6 = vcmp.eq.s32.totalorder %v2320_v24, 1 }
 0x2fe   : > { %v1829_v58 = vpop.f32.mrf.mxu3 }
 0x2ff   : > { %v4239_v53 = vadd.f32 %v1829_v58, %v1741_v33  ;;  %v2323_v33 = vpop.permute.xlu0 %2322 }
 0x300   : > { %vm2367_vm7 = vcmp.eq.s32.totalorder %v2323_v33, 1 }
 0x301   : > { %v1878_v32 = vmax.f32 %v4239_v53, 0.0 }
 0x303   : > { %v2134_v21 = vsel %vm2102_vm10, %v1878_v32, -3.4028235e+38  ;;  %vm2111_vm10 = vcmp.eq.s32.totalorder %v4169_v52, 1 }
 0x304   : > { %v2165_v2 = vmax.f32 %v2134_v21, %v2164_v35  ;;  %v1743_v13 = vpop.f32.mrf.mxu2 }
 0x305   : > { %v1744_v43 = vadd.f32 %v4161_v62, %v1743_v13  ;;  %v2395_v13 = vsel %vm2363_vm2, %v1878_v32, -3.4028235e+38 }
 0x306   : > { %v1832_v29 = vpop.f32.mrf.mxu3 }
 0x307   : > { %v4246_v56 = vadd.f32 %v1832_v29, %v1744_v43 }
 0x309   : > { %v1879_v26 = vmax.f32 %v4246_v56, 0.0 }
 0x30b   : > { %v2135_v44 = vsel %vm2103_vm11, %v1879_v26, -3.4028235e+38  ;;  %v2396_v60 = vsel %vm2364_vm3, %v1879_v26, -3.4028235e+38 }
 0x30c   : > { %v2166_v57 = vmax.f32 %v2135_v44, %v2165_v2  ;;  %v1745_v10 = vpop.f32.mrf.mxu2  ;;  %v3224_v2 = vmov -3.4028235e+38   ;;  %v2326_v44 = vpop.permute.xlu1 %2325 }
 0x30d   : > { %v1746_v39 = vadd.f32 %v4161_v62, %v1745_v10  ;;  %392 = vst [vmem:[%s4280_s14] sm:$0x3] %v3224_v2  ;;  %v2426_v10 = vmax.f32 %v2395_v13, %v4236_v38  ;;  %vm2368_vm8 = vcmp.eq.s32.totalorder %v2326_v44, 1 }
 0x30e   : > { %v1834_v59 = vpop.f32.mrf.mxu3 }
 0x30f   : > { %v4253_v28 = vadd.f32 %v1834_v59, %v1746_v39  ;;  %v2329_v39 = vpop.permute.xlu2 %2328  ;;  %v2427_v53 = vmax.f32 %v2396_v60, %v2426_v10 }
 0x310   : > { %vm2369_vm9 = vcmp.eq.s32.totalorder %v2329_v39, 1 }
 0x311   : > { %v1880_v25 = vmax.f32 %v4253_v28, 0.0 }
 0x313   : > { %v2136_v16 = vsel %vm2104_vm12, %v1880_v25, -3.4028235e+38  ;;  %v2397_v59 = vsel %vm2365_vm4, %v1880_v25, -3.4028235e+38 }
 0x314   : > { %v2167_v48 = vmax.f32 %v2136_v16, %v2166_v57  ;;  %v1748_v19 = vpop.f32.mrf.mxu2  ;;  %v2428_v56 = vmax.f32 %v2397_v59, %v2427_v53 }
 0x315   : > { %v1749_v1 = vadd.f32 %v4161_v62, %v1748_v19 }
 0x316   : > { %v1837_v50 = vpop.f32.mrf.mxu3 }
 0x317   : > { %v4260_v15 = vadd.f32 %v1837_v50, %v1749_v1  ;;  %v2332_v1 = vpop.permute.xlu0 %2331 }
 0x318   : > { %vm2370_vm11 = vcmp.eq.s32.totalorder %v2332_v1, 1 }
 0x319   : > { %v1881_v42 = vmax.f32 %v4260_v15, 0.0 }
 0x31b   : > { %v2137_v23 = vsel %vm2105_vm13, %v1881_v42, -3.4028235e+38  ;;  %v2398_v32 = vsel %vm2366_vm6, %v1881_v42, -3.4028235e+38 }
 0x31c   : > { %v2168_v55 = vmax.f32 %v2137_v23, %v2167_v48  ;;  %v1750_v4 = vpop.f32.mrf.mxu2  ;;  %v2429_v28 = vmax.f32 %v2398_v32, %v2428_v56 }
 0x31d   : > { %v1751_v49 = vadd.f32 %v4161_v62, %v1750_v4  ;;  %v2335_v4 = vpop.permute.xlu1 %2334 }
 0x31e   : > { %v1839_v8 = vpop.f32.mrf.mxu3  ;;  %vm2371_vm12 = vcmp.eq.s32.totalorder %v2335_v4, 1 }
 0x31f   : > { %v4267_v51 = vadd.f32 %v1839_v8, %v1751_v49  ;;  %v2338_v8 = vpop.permute.xlu2 %2337 }
 0x320   : > { %vm2372_vm13 = vcmp.eq.s32.totalorder %v2338_v8, 1 }
 0x321   : > { %v1882_v63 = vmax.f32 %v4267_v51, 0.0 }
 0x323   : > { %v2138_v20 = vsel %vm2106_vm14, %v1882_v63, -3.4028235e+38  ;;  %v2399_v50 = vsel %vm2367_vm7, %v1882_v63, -3.4028235e+38  ;;  %vm2112_vm14 = vcmp.eq.s32.totalorder %v4176_v61, 1 }
 0x324   : > { %v2169_v18 = vmax.f32 %v2138_v20, %v2168_v55  ;;  %v1753_v46 = vpop.f32.mrf.mxu2  ;;  %v2430_v11 = vmax.f32 %v2399_v50, %v2429_v28 }
 0x325   : > { %v1754_v12 = vadd.f32 %v4161_v62, %v1753_v46 }
 0x326   : > { %v1842_v34 = vpop.f32.mrf.mxu3 }
 0x327   : > { %v1843_v9 = vadd.f32 %v1842_v34, %v1754_v12 }
 0x329   : > { %v1883_v36 = vmax.f32 %v1843_v9, 0.0 }
 0x32b   : > { %v2139_v14 = vsel %vm2107_vm15, %v1883_v36, -3.4028235e+38  ;;  %v2400_v23 = vsel %vm2368_vm8, %v1883_v36, -3.4028235e+38 }
 0x32c   : > { %v2170_v27 = vmax.f32 %v2139_v14, %v2169_v18  ;;  %v1755_v3 = vpop.f32.mrf.mxu2  ;;  %v2431_v42 = vmax.f32 %v2400_v23, %v2430_v11  ;;  %v2341_v14 = vpop.permute.xlu0 %2340 }
 0x32d   : > { %v1756_v41 = vadd.f32 %v4161_v62, %v1755_v3  ;;  %vm2373_vm15 = vcmp.eq.s32.totalorder %v2341_v14, 1 }
 0x32e   : > { %v1844_v40 = vpop.f32.mrf.mxu3 }
 0x32f   : > { %v1845_v7 = vadd.f32 %v1844_v40, %v1756_v41 }
 0x331   : > { %v1884_v6 = vmax.f32 %v1845_v7, 0.0 }
 0x333   : > { %v2140_v54 = vsel %vm2108_vm0, %v1884_v6, -3.4028235e+38  ;;  %v2401_v49 = vsel %vm2369_vm9, %v1884_v6, -3.4028235e+38  ;;  %vm2443_vm0 = vcmask 1040384  }
 0x334   : > { %v2173_v5 = vmax.f32 %v2140_v54, %v2170_v27  ;;  %v1758_v47 = vpop.f32.mrf.mxu2  ;;  %v2434_v63 = vmax.f32 %v2401_v49, %v2431_v42 }
 0x335   : > { %v1759_v30 = vadd.f32 %v4161_v62, %v1758_v47 }
 0x336   : > { %v1847_v31 = vpop.f32.mrf.mxu3 }
 0x337   : > { %v1848_v35 = vadd.f32 %v1847_v31, %v1759_v30 }
 0x339   : > { %v1885_v17 = vmax.f32 %v1848_v35, 0.0 }
 0x33b   : > { %v2141_v58 = vsel %vm2109_vm1, %v1885_v17, -3.4028235e+38  ;;  %v2402_v51 = vsel %vm2370_vm11, %v1885_v17, -3.4028235e+38 }
 0x33c   : > { %v2171_v21 = vmax.f32 %v2141_v58, %v2173_v5  ;;  %v1760_v22 = vpop.f32.mrf.mxu2  ;;  %v2432_v9 = vmax.f32 %v2402_v51, %v2434_v63  ;;  %v2445_v58 = vld [vmem:[%s4280_s14] sm:$0x3] }
 0x33d   : > { %v1761_v43 = vadd.f32 %v4161_v62, %v1760_v22 }
 0x33e   : > { %v1849_v29 = vpop.f32.mrf.mxu3 }
 0x33f   : > { %v1850_v57 = vadd.f32 %v1849_v29, %v1761_v43 }
 0x341   : > { %v1886_v16 = vmax.f32 %v1850_v57, 0.0 }
 0x343   : > { %v2142_v48 = vsel %vm2110_vm5, %v1886_v16, -3.4028235e+38  ;;  %v2403_v12 = vsel %vm2371_vm12, %v1886_v16, -3.4028235e+38 }
 0x344   : > { %v2172_v26 = vmax.f32 %v2142_v48, %v2171_v21  ;;  %v1763_v19 = vpop.f32.mrf.mxu2  ;;  %v2433_v52 = vmax.f32 %v2403_v12, %v2432_v9 }
 0x345   : > { %v1764_v38 = vadd.f32 %v4161_v62, %v1763_v19 }
 0x346   : > { %v1852_v25 = vpop.f32.mrf.mxu3 }
 0x347   : > { %v1853_v55 = vadd.f32 %v1852_v25, %v1764_v38 }
 0x349   : > { %v1887_v15 = vmax.f32 %v1853_v55, 0.0 }
 0x34b   : > { %v2143_v20 = vsel %vm2111_vm10, %v1887_v15, -3.4028235e+38  ;;  %v2404_v27 = vsel %vm2372_vm13, %v1887_v15, -3.4028235e+38 }
 0x34c   : > { %v2174_v18 = vmax.f32 %v2143_v20, %v2172_v26  ;;  %v1765_v46 = vpop.f32.mrf.mxu2  ;;  %v2435_v41 = vmax.f32 %v2404_v27, %v2433_v52 }
 0x34d   : > { %v1766_v34 = vadd.f32 %v4161_v62, %v1765_v46 }
 0x34e   : > { %v1854_v36 = vpop.f32.mrf.mxu3 }
 0x34f   : > { %v1855_v3 = vadd.f32 %v1854_v36, %v1766_v34 }
 0x351   : > { %v1888_v0 = vmax.f32 %v1855_v3, 0.0 }
 0x353   : > { %v2144_v40 = vsel %vm2112_vm14, %v1888_v0, -3.4028235e+38  ;;  %v2405_v7 = vsel %vm2373_vm15, %v1888_v0, -3.4028235e+38 }
 0x354   : > { %v2175_v45 = vmax.f32 %v2144_v40, %v2174_v18  ;;  %v2436_v6 = vmax.f32 %v2405_v7, %v2435_v41 }
 0x356   : > { %v2176_v54 = vrot.slane %v2175_v45, 4  ;;  %v2437_v62 = vrot.slane %v2436_v6, 4 }
 0x358   : > { %v2177_v5 = vmax.f32 %v2175_v45, %v2176_v54  ;;  %v2438_v47 = vmax.f32 %v2436_v6, %v2437_v62 }
 0x35a   : > { %v2178_v37 = vrot.slane %v2177_v5, 2  ;;  %v2439_v30 = vrot.slane %v2438_v47, 2 }
 0x35c   : > { %v2179_v31 = vmax.f32 %v2177_v5, %v2178_v37  ;;  %v2440_v24 = vmax.f32 %v2438_v47, %v2439_v30 }
 0x35e   : > { %v2180_v61 = vrot.slane %v2179_v31, 1  ;;  %v2441_v35 = vrot.slane %v2440_v24, 1 }
 0x360   : > { %v2181_v17 = vmax.f32 %v2179_v31, %v2180_v61  ;;  %v2442_v33 = vmax.f32 %v2440_v24, %v2441_v35 }
 0x362   : > { %v2444_v21 = vsel %vm2443_vm0, %v2181_v17, %v2442_v33 }
 0x363   : > { %v2446_v22 = vmax.f32 %v2445_v58, %v2444_v21 }
 0x365   : > { %2447 = vst [vmem:[%s4280_s14] sm:$0x3] %v2446_v22 }
 0x366   : > { %3156 = shalt.err (!%p3153_p9)
}
 0x367   : > { %2991 = dma.vmem_to_hbm [thread:$0]  (%p3310_p4), %s2462_s13, 32, %s2464_s20, %s2449_s30  }
 0x368 PF: > { %p3008_p10 = scmp.ge.s32.totalorder %s3215_s10, 2  ;;  %s2475_s12 = sand.u32 1, %s3195_s27  }
 0x369   : > { %s2476_s14 = scalar_lea.sflag [#allocation4], %s2475_s12 }
 0x36a   : > { %p3001_p11 = pnand %p3008_p10, %p3317_p8 }
 0x36c   : > { %p3002_p12 = pneg %p3001_p11 }
 0x36e   : > { %3190 = dma.done.wait (%p3002_p12), %s2476_s14, 32  }
 0x36f   : > { %3192 = vsyncadd (%p3002_p12), %s2476_s14, 4294967264  ;;  %s23_s10 = sadd.s32 1, %s3215_s10   ;;  %s4371_s15 = sld [smem:[#allocation11_spill]] }
 0x370   : > { %p20_p13 = scmp.ge.s32.totalorder %s23_s10, 4   ;;  %s4372_s27 = smov %s3199_s28 }
 0x371   : > { %s4373_s28 = smov %s3203_s29  ;;  %s4374_s29 = smov %s3323_s18 }
 0x372   : > { %s4375_s30 = smov %s3211_s9  ;;  %22 = sbr.rel (!%p20_p13) target bundleno = 8 (0x8), region = 103 }
 0x375   : > { %s4376_s9 = smov %s4371_s15 }
 0x377   :  { %2482 = vsyncpa [#allocation3], 1 }
 0x378   :  { %2484 = vsyncpa [#allocation3 + $0x1], 1 }
 0x379   :  { %2485 = vsyncpa [#allocation6], 1 }
 0x37a   :  { %2486 = vsyncpa [#allocation4], 1 }
 0x37b   :  { %2488 = vsyncpa [#allocation4 + $0x1], 1 }

</bundles_post_ra>
